<compile_context>
chip_gen: v7x
topology: tpu7x:2x2x1
jax: 0.10.0
libtpu: 0.0.40
codegen_flags: <defaults>
</compile_context>

<pallas_src>
import jax
import jax.numpy as jnp
from jax import lax
from jax.experimental import pallas as pl
from jax.experimental.pallas import tpu as pltpu


# ---------------------------------------------------------------------------
# Fused kernel
# ---------------------------------------------------------------------------
def _make_fused_kernel(n_lstm: int):
    """Builds the fused kernel for `n_lstm` stacked LSTM layers + MLP head.

    Ref order: x, (w_ih, w_hh, b) * n_lstm, w1, b1, w2_row, b2, out,
               g_scr (T,B,4H), y_scr (T,B,H).
    Weights are pre-transposed ((D,4H)/(H,4H)) and gate columns pre-permuted
    to (i, f, o | g); bias = bias_ih + bias_hh, shape (1, 4H).
    """

    def kernel(*refs):
        x_ref = refs[0]                                        # (B, T, D) batch_first
        lstm_refs = refs[1:1 + 3 * n_lstm]
        w1_ref, b1_ref, w2_ref, b2_ref = refs[1 + 3 * n_lstm:1 + 3 * n_lstm + 4]
        o_ref = refs[1 + 3 * n_lstm + 4]                       # (B, T)
        g_scr, y_scr = refs[1 + 3 * n_lstm + 5:]               # (T,B,4H), (T,B,H)

        B, T, _ = x_ref.shape
        H = y_scr.shape[-1]

        def recurrence(whh_ref):
            """Serial LSTM recurrence; input gates already staged in g_scr."""

            def step(t, carry):
                h, c = carry
                gates = g_scr[t] + jnp.dot(h, whh_ref[...],
                                           preferred_element_type=jnp.float32)
                # columns pre-permuted to (i, f, o | g): 2 EUP calls per step
                sig = jax.nn.sigmoid(gates[:, :3 * H])
                g_gate = jnp.tanh(gates[:, 3 * H:])
                i_gate = sig[:, :H]
                f_gate = sig[:, H:2 * H]
                o_gate = sig[:, 2 * H:3 * H]
                c_new = f_gate * c + i_gate * g_gate
                h_new = o_gate * jnp.tanh(c_new)
                y_scr[t] = jnp.tanh(h_new)                     # lstm_activation (per layer)
                return h_new, c_new

            init = (jnp.zeros((B, H), jnp.float32),
                    jnp.zeros((B, H), jnp.float32))
            _ = lax.fori_loop(0, T, step, init, unroll=True)

        # ---- layer 0: hoisted input projection from batch-first x ----------
        wih0, whh0, bg0 = lstm_refs[0:3]
        xv = x_ref[...]                                        # (B, T, D)
        # time-major row matrix (rows ordered (t, b)); static slices + concat
        x_tm = jnp.concatenate([xv[:, t, :] for t in range(T)], axis=0)   # (T*B, D)
        g_tm = jnp.dot(x_tm, wih0[...],
                       preferred_element_type=jnp.float32) + bg0[...]     # (T*B, 4H)
        for t in range(T):                                     # static stage into scratch
            g_scr[t] = g_tm[t * B:(t + 1) * B, :]
        recurrence(whh0)

        # ---- remaining LSTM layers: input is y_scr (already time-major) ----
        for layer in range(1, n_lstm):
            wih, whh, bg = lstm_refs[3 * layer:3 * layer + 3]
            y_flat = jnp.concatenate([y_scr[t] for t in range(T)], axis=0)  # (T*B, H)
            g_tm = jnp.dot(y_flat, wih[...],
                           preferred_element_type=jnp.float32) + bg[...]
            for t in range(T):
                g_scr[t] = g_tm[t * B:(t + 1) * B, :]
            recurrence(whh)

        # ---- MLP head: Linear -> relu -> Linear(1) -> sigmoid --------------
        feats = jnp.concatenate([y_scr[t] for t in range(T)], axis=0)       # (T*B, H)
        hid = jnp.dot(feats, w1_ref[...],
                      preferred_element_type=jnp.float32) + b1_ref[...]
        hid = jnp.maximum(hid, 0.0)                                         # relu
        # (L,1) matmul replaced by broadcast-mul + lane reduce
        z = jnp.sum(hid * w2_ref[...], axis=-1, keepdims=True) + b2_ref[...]
        z = jax.nn.sigmoid(z)                                               # (T*B, 1)
        # rows are (t, b)-ordered -> scatter into (B, T) lane-oriented output
        o_ref[...] = jnp.concatenate(
            [z[t * B:(t + 1) * B, :] for t in range(T)], axis=1)

    return kernel


# ---------------------------------------------------------------------------
# Wrapper
# ---------------------------------------------------------------------------
_VMEM = pl.BlockSpec(memory_space=pltpu.MemorySpace.VMEM)


@jax.jit
def lstm_linear_forward(x_btd, packed_lstm, w1, b1, w2_row, b2):
    """Full forward of LSTM_Linear. x_btd: (B, T, D) batch_first -> (B, T, 1)."""
    B, T, _ = x_btd.shape
    n_lstm = len(packed_lstm)
    H = packed_lstm[0][1].shape[0]
    for (_, w_hh, _) in packed_lstm:
        assert w_hh.shape[0] == H, "fused kernel reuses scratch; equal hidden sizes required"
    flat = [a for layer in packed_lstm for a in layer]
    out = pl.pallas_call(
        _make_fused_kernel(n_lstm),
        out_shape=jax.ShapeDtypeStruct((B, T), jnp.float32),
        in_specs=[_VMEM] * (1 + 3 * n_lstm + 4),
        out_specs=_VMEM,
        scratch_shapes=[pltpu.VMEM((T, B, 4 * H), jnp.float32),   # staged gates_in
                        pltpu.VMEM((T, B, H), jnp.float32)],      # layer outputs (tanh(h))
    )(x_btd, *flat, w1, b1, w2_row, b2)
    return out[:, :, None]                                        # (B, T, 1)


# ---------------------------------------------------------------------------
# Deterministic synthetic parameters (PyTorch layout) + one-time repack
# ---------------------------------------------------------------------------
def init_params(key, input_size, lstm_sizes, linear_size):
    """PyTorch-style layout: w_ih (D,4H), w_hh (H,4H), gate order (i,f,g,o),
    bias = bias_ih + bias_hh of shape (1,4H); linear weights pre-transposed."""
    lstm_params = []
    d = input_size
    for h in lstm_sizes:
        key, k1, k2, k3 = jax.random.split(key, 4)
        s = 1.0 / jnp.sqrt(h)
        w_ih = jax.random.uniform(k1, (d, 4 * h), jnp.float32, -s, s)
        w_hh = jax.random.uniform(k2, (h, 4 * h), jnp.float32, -s, s)
        b = jax.random.uniform(k3, (1, 4 * h), jnp.float32, -s, s)
        lstm_params.append((w_ih, w_hh, b))
        d = h
    key, k1, k2, k3, k4 = jax.random.split(key, 5)
    s1 = 1.0 / jnp.sqrt(d)
    w1 = jax.random.uniform(k1, (d, linear_size), jnp.float32, -s1, s1)
    b1 = jax.random.uniform(k2, (1, linear_size), jnp.float32, -s1, s1)
    s2 = 1.0 / jnp.sqrt(linear_size)
    w2 = jax.random.uniform(k3, (linear_size, 1), jnp.float32, -s2, s2)
    b2 = jax.random.uniform(k4, (1, 1), jnp.float32, -s2, s2)
    return lstm_params, w1, b1, w2, b2


def pack_params(lstm_params, w1, b1, w2, b2):
    """One-time repack for the kernel: permute gate columns (i,f,g,o)->(i,f,o,g)
    and turn the (L,1) output weight into a (1,L) row for the lane-reduce head."""
    def perm(w):
        h = w.shape[-1] // 4
        return jnp.concatenate([w[:, :2 * h], w[:, 3 * h:], w[:, 2 * h:3 * h]], axis=1)
    packed = [(perm(w_ih), perm(w_hh), perm(b)) for (w_ih, w_hh, b) in lstm_params]
    return packed, w1, b1, jnp.transpose(w2), b2


if __name__ == "__main__":
    # Small shapes consistent with the module: batch=2, seq=8, input_size=16,
    # lstm_layers=[32, 32], linear_layers=[32], output -> 1.
    # (Last LSTM hidden == linear width so the reference module's output-layer
    #  in_features quirk stays consistent.)
    # TODO(synk): dropout_layers default to [] and inference dropout is identity,
    # so no dropout is implemented.
    B, T, D = 2, 8, 16
    lstm_sizes = [32, 32]
    linear_size = 32

    key = jax.random.PRNGKey(0)
    key, kx = jax.random.split(key)
    x = jax.random.normal(kx, (B, T, D), jnp.float32)

    params = init_params(key, D, lstm_sizes, linear_size)
    packed_lstm, w1, b1, w2_row, b2 = pack_params(*params)

    out = lstm_linear_forward(x, packed_lstm, w1, b1, w2_row, b2)
    out = jax.block_until_ready(out)
    assert out.shape == (B, T, 1), out.shape
    assert bool(jnp.all(jnp.isfinite(out)))
    assert bool(jnp.all((out >= 0.0) & (out <= 1.0)))  # sigmoid range
    print("KERNEL_OK")
</pallas_src>

<mosaic_0001>
module attributes {stable_mosaic.version = 11 : i64} {
  func.func @kernel(%arg0: memref<2x8x16xf32, #tpu.memory_space<vmem>>, %arg1: memref<16x128xf32, #tpu.memory_space<vmem>>, %arg2: memref<32x128xf32, #tpu.memory_space<vmem>>, %arg3: memref<1x128xf32, #tpu.memory_space<vmem>>, %arg4: memref<32x128xf32, #tpu.memory_space<vmem>>, %arg5: memref<32x128xf32, #tpu.memory_space<vmem>>, %arg6: memref<1x128xf32, #tpu.memory_space<vmem>>, %arg7: memref<32x32xf32, #tpu.memory_space<vmem>>, %arg8: memref<1x32xf32, #tpu.memory_space<vmem>>, %arg9: memref<1x32xf32, #tpu.memory_space<vmem>>, %arg10: memref<1x1xf32, #tpu.memory_space<vmem>>, %arg11: memref<2x8xf32, #tpu.memory_space<vmem>>, %arg12: memref<8x2x128xf32, #tpu.memory_space<vmem>>, %arg13: memref<8x2x32xf32, #tpu.memory_space<vmem>>) attributes {dimension_semantics = [], scalar_prefetch = 0 : i64, scratch_operands = 2 : i64, tpu.core_type = #tpu.core_type<tc>} {
    %c0 = arith.constant 0 : index
    %c0_0 = arith.constant 0 : index
    %c0_1 = arith.constant 0 : index
    %0 = vector.load %arg0[%c0, %c0_0, %c0_1] : memref<2x8x16xf32, #tpu.memory_space<vmem>>, vector<2x8x16xf32>
    %1 = vector.extract_strided_slice %0 {offsets = [0, 0, 0], sizes = [2, 1, 16], strides = [1, 1, 1]} : vector<2x8x16xf32> to vector<2x1x16xf32>
    %2 = vector.shape_cast %1 : vector<2x1x16xf32> to vector<2x16xf32>
    %3 = vector.extract_strided_slice %0 {offsets = [0, 1, 0], sizes = [2, 1, 16], strides = [1, 1, 1]} : vector<2x8x16xf32> to vector<2x1x16xf32>
    %4 = vector.shape_cast %3 : vector<2x1x16xf32> to vector<2x16xf32>
    %5 = vector.extract_strided_slice %0 {offsets = [0, 2, 0], sizes = [2, 1, 16], strides = [1, 1, 1]} : vector<2x8x16xf32> to vector<2x1x16xf32>
    %6 = vector.shape_cast %5 : vector<2x1x16xf32> to vector<2x16xf32>
    %7 = vector.extract_strided_slice %0 {offsets = [0, 3, 0], sizes = [2, 1, 16], strides = [1, 1, 1]} : vector<2x8x16xf32> to vector<2x1x16xf32>
    %8 = vector.shape_cast %7 : vector<2x1x16xf32> to vector<2x16xf32>
    %9 = vector.extract_strided_slice %0 {offsets = [0, 4, 0], sizes = [2, 1, 16], strides = [1, 1, 1]} : vector<2x8x16xf32> to vector<2x1x16xf32>
    %10 = vector.shape_cast %9 : vector<2x1x16xf32> to vector<2x16xf32>
    %11 = vector.extract_strided_slice %0 {offsets = [0, 5, 0], sizes = [2, 1, 16], strides = [1, 1, 1]} : vector<2x8x16xf32> to vector<2x1x16xf32>
    %12 = vector.shape_cast %11 : vector<2x1x16xf32> to vector<2x16xf32>
    %13 = vector.extract_strided_slice %0 {offsets = [0, 6, 0], sizes = [2, 1, 16], strides = [1, 1, 1]} : vector<2x8x16xf32> to vector<2x1x16xf32>
    %14 = vector.shape_cast %13 : vector<2x1x16xf32> to vector<2x16xf32>
    %15 = vector.extract_strided_slice %0 {offsets = [0, 7, 0], sizes = [2, 1, 16], strides = [1, 1, 1]} : vector<2x8x16xf32> to vector<2x1x16xf32>
    %16 = vector.shape_cast %15 : vector<2x1x16xf32> to vector<2x16xf32>
    %17 = tpu.concatenate %2, %4, %6, %8, %10, %12, %14, %16 in 0 : vector<2x16xf32>, vector<2x16xf32>, vector<2x16xf32>, vector<2x16xf32>, vector<2x16xf32>, vector<2x16xf32>, vector<2x16xf32>, vector<2x16xf32> -> vector<16x16xf32>
    %c0_2 = arith.constant 0 : index
    %c0_3 = arith.constant 0 : index
    %18 = vector.load %arg1[%c0_2, %c0_3] : memref<16x128xf32, #tpu.memory_space<vmem>>, vector<16x128xf32>
    %cst = arith.constant dense<0.000000e+00> : vector<16x128xf32>
    %19 = tpu.matmul %17, %18, %cst {dimension_numbers = #tpu.dot_dimension_numbers<[1], [0], [0], [1], [0, 0, 1, 1], [], []>} : vector<16x16xf32>, vector<16x128xf32>, vector<16x128xf32> -> vector<16x128xf32>
    %c0_4 = arith.constant 0 : index
    %c0_5 = arith.constant 0 : index
    %20 = vector.load %arg3[%c0_4, %c0_5] : memref<1x128xf32, #tpu.memory_space<vmem>>, vector<1x128xf32>
    %21 = vector.broadcast %20 : vector<1x128xf32> to vector<16x128xf32>
    %22 = arith.addf %19, %21 : vector<16x128xf32>
    %23 = vector.extract_strided_slice %22 {offsets = [0, 0], sizes = [2, 128], strides = [1, 1]} : vector<16x128xf32> to vector<2x128xf32>
    %c0_6 = arith.constant 0 : index
    %c0_7 = arith.constant 0 : index
    %c0_8 = arith.constant 0 : index
    %24 = vector.load %arg12[%c0_6, %c0_7, %c0_8] : memref<8x2x128xf32, #tpu.memory_space<vmem>>, vector<1x2x128xf32>
    %25 = vector.shape_cast %24 : vector<1x2x128xf32> to vector<2x128xf32>
    %26 = vector.shape_cast %23 : vector<2x128xf32> to vector<1x2x128xf32>
    tpu.vector_store %arg12[%c0_6, %c0_7, %c0_8], %26 {strides = array<i32>} : memref<8x2x128xf32, #tpu.memory_space<vmem>>, vector<1x2x128xf32>,
    %27 = vector.extract_strided_slice %22 {offsets = [2, 0], sizes = [2, 128], strides = [1, 1]} : vector<16x128xf32> to vector<2x128xf32>
    %c1 = arith.constant 1 : index
    %c0_9 = arith.constant 0 : index
    %c0_10 = arith.constant 0 : index
    %28 = vector.load %arg12[%c1, %c0_9, %c0_10] : memref<8x2x128xf32, #tpu.memory_space<vmem>>, vector<1x2x128xf32>
    %29 = vector.shape_cast %28 : vector<1x2x128xf32> to vector<2x128xf32>
    %30 = vector.shape_cast %27 : vector<2x128xf32> to vector<1x2x128xf32>
    tpu.vector_store %arg12[%c1, %c0_9, %c0_10], %30 {strides = array<i32>} : memref<8x2x128xf32, #tpu.memory_space<vmem>>, vector<1x2x128xf32>,
    %31 = vector.extract_strided_slice %22 {offsets = [4, 0], sizes = [2, 128], strides = [1, 1]} : vector<16x128xf32> to vector<2x128xf32>
    %c2 = arith.constant 2 : index
    %c0_11 = arith.constant 0 : index
    %c0_12 = arith.constant 0 : index
    %32 = vector.load %arg12[%c2, %c0_11, %c0_12] : memref<8x2x128xf32, #tpu.memory_space<vmem>>, vector<1x2x128xf32>
    %33 = vector.shape_cast %32 : vector<1x2x128xf32> to vector<2x128xf32>
    %34 = vector.shape_cast %31 : vector<2x128xf32> to vector<1x2x128xf32>
    tpu.vector_store %arg12[%c2, %c0_11, %c0_12], %34 {strides = array<i32>} : memref<8x2x128xf32, #tpu.memory_space<vmem>>, vector<1x2x128xf32>,
    %35 = vector.extract_strided_slice %22 {offsets = [6, 0], sizes = [2, 128], strides = [1, 1]} : vector<16x128xf32> to vector<2x128xf32>
    %c3 = arith.constant 3 : index
    %c0_13 = arith.constant 0 : index
    %c0_14 = arith.constant 0 : index
    %36 = vector.load %arg12[%c3, %c0_13, %c0_14] : memref<8x2x128xf32, #tpu.memory_space<vmem>>, vector<1x2x128xf32>
    %37 = vector.shape_cast %36 : vector<1x2x128xf32> to vector<2x128xf32>
    %38 = vector.shape_cast %35 : vector<2x128xf32> to vector<1x2x128xf32>
    tpu.vector_store %arg12[%c3, %c0_13, %c0_14], %38 {strides = array<i32>} : memref<8x2x128xf32, #tpu.memory_space<vmem>>, vector<1x2x128xf32>,
    %39 = vector.extract_strided_slice %22 {offsets = [8, 0], sizes = [2, 128], strides = [1, 1]} : vector<16x128xf32> to vector<2x128xf32>
    %c4 = arith.constant 4 : index
    %c0_15 = arith.constant 0 : index
    %c0_16 = arith.constant 0 : index
    %40 = vector.load %arg12[%c4, %c0_15, %c0_16] : memref<8x2x128xf32, #tpu.memory_space<vmem>>, vector<1x2x128xf32>
    %41 = vector.shape_cast %40 : vector<1x2x128xf32> to vector<2x128xf32>
    %42 = vector.shape_cast %39 : vector<2x128xf32> to vector<1x2x128xf32>
    tpu.vector_store %arg12[%c4, %c0_15, %c0_16], %42 {strides = array<i32>} : memref<8x2x128xf32, #tpu.memory_space<vmem>>, vector<1x2x128xf32>,
    %43 = vector.extract_strided_slice %22 {offsets = [10, 0], sizes = [2, 128], strides = [1, 1]} : vector<16x128xf32> to vector<2x128xf32>
    %c5 = arith.constant 5 : index
    %c0_17 = arith.constant 0 : index
    %c0_18 = arith.constant 0 : index
    %44 = vector.load %arg12[%c5, %c0_17, %c0_18] : memref<8x2x128xf32, #tpu.memory_space<vmem>>, vector<1x2x128xf32>
    %45 = vector.shape_cast %44 : vector<1x2x128xf32> to vector<2x128xf32>
    %46 = vector.shape_cast %43 : vector<2x128xf32> to vector<1x2x128xf32>
    tpu.vector_store %arg12[%c5, %c0_17, %c0_18], %46 {strides = array<i32>} : memref<8x2x128xf32, #tpu.memory_space<vmem>>, vector<1x2x128xf32>,
    %47 = vector.extract_strided_slice %22 {offsets = [12, 0], sizes = [2, 128], strides = [1, 1]} : vector<16x128xf32> to vector<2x128xf32>
    %c6 = arith.constant 6 : index
    %c0_19 = arith.constant 0 : index
    %c0_20 = arith.constant 0 : index
    %48 = vector.load %arg12[%c6, %c0_19, %c0_20] : memref<8x2x128xf32, #tpu.memory_space<vmem>>, vector<1x2x128xf32>
    %49 = vector.shape_cast %48 : vector<1x2x128xf32> to vector<2x128xf32>
    %50 = vector.shape_cast %47 : vector<2x128xf32> to vector<1x2x128xf32>
    tpu.vector_store %arg12[%c6, %c0_19, %c0_20], %50 {strides = array<i32>} : memref<8x2x128xf32, #tpu.memory_space<vmem>>, vector<1x2x128xf32>,
    %51 = vector.extract_strided_slice %22 {offsets = [14, 0], sizes = [2, 128], strides = [1, 1]} : vector<16x128xf32> to vector<2x128xf32>
    %c7 = arith.constant 7 : index
    %c0_21 = arith.constant 0 : index
    %c0_22 = arith.constant 0 : index
    %52 = vector.load %arg12[%c7, %c0_21, %c0_22] : memref<8x2x128xf32, #tpu.memory_space<vmem>>, vector<1x2x128xf32>
    %53 = vector.shape_cast %52 : vector<1x2x128xf32> to vector<2x128xf32>
    %54 = vector.shape_cast %51 : vector<2x128xf32> to vector<1x2x128xf32>
    tpu.vector_store %arg12[%c7, %c0_21, %c0_22], %54 {strides = array<i32>} : memref<8x2x128xf32, #tpu.memory_space<vmem>>, vector<1x2x128xf32>,
    %cst_23 = arith.constant 0.000000e+00 : f32
    %55 = vector.broadcast %cst_23 : f32 to vector<2x32xf32>
    %cst_24 = arith.constant 0.000000e+00 : f32
    %56 = vector.broadcast %cst_24 : f32 to vector<2x32xf32>
    %c0_i32 = arith.constant 0 : i32
    %57 = arith.index_cast %c0_i32 : i32 to index
    %c0_25 = arith.constant 0 : index
    %c0_26 = arith.constant 0 : index
    %58 = vector.load %arg12[%57, %c0_25, %c0_26] : memref<8x2x128xf32, #tpu.memory_space<vmem>>, vector<1x2x128xf32>
    %59 = vector.shape_cast %58 : vector<1x2x128xf32> to vector<2x128xf32>
    %c0_27 = arith.constant 0 : index
    %c0_28 = arith.constant 0 : index
    %60 = vector.load %arg2[%c0_27, %c0_28] : memref<32x128xf32, #tpu.memory_space<vmem>>, vector<32x128xf32>
    %cst_29 = arith.constant dense<0.000000e+00> : vector<2x128xf32>
    %61 = tpu.matmul %55, %60, %cst_29 {dimension_numbers = #tpu.dot_dimension_numbers<[1], [0], [0], [1], [0, 0, 1, 1], [], []>} : vector<2x32xf32>, vector<32x128xf32>, vector<2x128xf32> -> vector<2x128xf32>
    %62 = arith.addf %59, %61 : vector<2x128xf32>
    %63 = vector.extract_strided_slice %62 {offsets = [0, 0], sizes = [2, 96], strides = [1, 1]} : vector<2x128xf32> to vector<2x96xf32>
    %64 = arith.negf %63 : vector<2x96xf32>
    %65 = math.exp %64 : vector<2x96xf32>
    %cst_30 = arith.constant 1.000000e+00 : f32
    %66 = vector.broadcast %cst_30 : f32 to vector<2x96xf32>
    %67 = arith.addf %66, %65 : vector<2x96xf32>
    %68 = arith.divf %66, %67 : vector<2x96xf32>
    %69 = vector.extract_strided_slice %62 {offsets = [0, 96], sizes = [2, 32], strides = [1, 1]} : vector<2x128xf32> to vector<2x32xf32>
    %70 = math.tanh %69 : vector<2x32xf32>
    %71 = vector.extract_strided_slice %68 {offsets = [0, 0], sizes = [2, 32], strides = [1, 1]} : vector<2x96xf32> to vector<2x32xf32>
    %72 = vector.extract_strided_slice %68 {offsets = [0, 32], sizes = [2, 32], strides = [1, 1]} : vector<2x96xf32> to vector<2x32xf32>
    %73 = vector.extract_strided_slice %68 {offsets = [0, 64], sizes = [2, 32], strides = [1, 1]} : vector<2x96xf32> to vector<2x32xf32>
    %74 = arith.mulf %72, %56 : vector<2x32xf32>
    %75 = arith.mulf %71, %70 : vector<2x32xf32>
    %76 = arith.addf %74, %75 : vector<2x32xf32>
    %77 = math.tanh %76 : vector<2x32xf32>
    %78 = arith.mulf %73, %77 : vector<2x32xf32>
    %79 = math.tanh %78 : vector<2x32xf32>
    %80 = arith.index_cast %c0_i32 : i32 to index
    %c0_31 = arith.constant 0 : index
    %c0_32 = arith.constant 0 : index
    %81 = vector.load %arg13[%80, %c0_31, %c0_32] : memref<8x2x32xf32, #tpu.memory_space<vmem>>, vector<1x2x32xf32>
    %82 = vector.shape_cast %81 : vector<1x2x32xf32> to vector<2x32xf32>
    %83 = vector.shape_cast %79 : vector<2x32xf32> to vector<1x2x32xf32>
    tpu.vector_store %arg13[%80, %c0_31, %c0_32], %83 {strides = array<i32>} : memref<8x2x32xf32, #tpu.memory_space<vmem>>, vector<1x2x32xf32>,
    %c1_i32 = arith.constant 1 : i32
    %84 = arith.index_cast %c1_i32 : i32 to index
    %c0_33 = arith.constant 0 : index
    %c0_34 = arith.constant 0 : index
    %85 = vector.load %arg12[%84, %c0_33, %c0_34] : memref<8x2x128xf32, #tpu.memory_space<vmem>>, vector<1x2x128xf32>
    %86 = vector.shape_cast %85 : vector<1x2x128xf32> to vector<2x128xf32>
    %c0_35 = arith.constant 0 : index
    %c0_36 = arith.constant 0 : index
    %87 = vector.load %arg2[%c0_35, %c0_36] : memref<32x128xf32, #tpu.memory_space<vmem>>, vector<32x128xf32>
    %cst_37 = arith.constant dense<0.000000e+00> : vector<2x128xf32>
    %88 = tpu.matmul %78, %87, %cst_37 {dimension_numbers = #tpu.dot_dimension_numbers<[1], [0], [0], [1], [0, 0, 1, 1], [], []>} : vector<2x32xf32>, vector<32x128xf32>, vector<2x128xf32> -> vector<2x128xf32>
    %89 = arith.addf %86, %88 : vector<2x128xf32>
    %90 = vector.extract_strided_slice %89 {offsets = [0, 0], sizes = [2, 96], strides = [1, 1]} : vector<2x128xf32> to vector<2x96xf32>
    %91 = arith.negf %90 : vector<2x96xf32>
    %92 = math.exp %91 : vector<2x96xf32>
    %cst_38 = arith.constant 1.000000e+00 : f32
    %93 = vector.broadcast %cst_38 : f32 to vector<2x96xf32>
    %94 = arith.addf %93, %92 : vector<2x96xf32>
    %95 = arith.divf %93, %94 : vector<2x96xf32>
    %96 = vector.extract_strided_slice %89 {offsets = [0, 96], sizes = [2, 32], strides = [1, 1]} : vector<2x128xf32> to vector<2x32xf32>
    %97 = math.tanh %96 : vector<2x32xf32>
    %98 = vector.extract_strided_slice %95 {offsets = [0, 0], sizes = [2, 32], strides = [1, 1]} : vector<2x96xf32> to vector<2x32xf32>
    %99 = vector.extract_strided_slice %95 {offsets = [0, 32], sizes = [2, 32], strides = [1, 1]} : vector<2x96xf32> to vector<2x32xf32>
    %100 = vector.extract_strided_slice %95 {offsets = [0, 64], sizes = [2, 32], strides = [1, 1]} : vector<2x96xf32> to vector<2x32xf32>
    %101 = arith.mulf %99, %76 : vector<2x32xf32>
    %102 = arith.mulf %98, %97 : vector<2x32xf32>
    %103 = arith.addf %101, %102 : vector<2x32xf32>
    %104 = math.tanh %103 : vector<2x32xf32>
    %105 = arith.mulf %100, %104 : vector<2x32xf32>
    %106 = math.tanh %105 : vector<2x32xf32>
    %107 = arith.index_cast %c1_i32 : i32 to index
    %c0_39 = arith.constant 0 : index
    %c0_40 = arith.constant 0 : index
    %108 = vector.load %arg13[%107, %c0_39, %c0_40] : memref<8x2x32xf32, #tpu.memory_space<vmem>>, vector<1x2x32xf32>
    %109 = vector.shape_cast %108 : vector<1x2x32xf32> to vector<2x32xf32>
    %110 = vector.shape_cast %106 : vector<2x32xf32> to vector<1x2x32xf32>
    tpu.vector_store %arg13[%107, %c0_39, %c0_40], %110 {strides = array<i32>} : memref<8x2x32xf32, #tpu.memory_space<vmem>>, vector<1x2x32xf32>,
    %c2_i32 = arith.constant 2 : i32
    %111 = arith.index_cast %c2_i32 : i32 to index
    %c0_41 = arith.constant 0 : index
    %c0_42 = arith.constant 0 : index
    %112 = vector.load %arg12[%111, %c0_41, %c0_42] : memref<8x2x128xf32, #tpu.memory_space<vmem>>, vector<1x2x128xf32>
    %113 = vector.shape_cast %112 : vector<1x2x128xf32> to vector<2x128xf32>
    %c0_43 = arith.constant 0 : index
    %c0_44 = arith.constant 0 : index
    %114 = vector.load %arg2[%c0_43, %c0_44] : memref<32x128xf32, #tpu.memory_space<vmem>>, vector<32x128xf32>
    %cst_45 = arith.constant dense<0.000000e+00> : vector<2x128xf32>
    %115 = tpu.matmul %105, %114, %cst_45 {dimension_numbers = #tpu.dot_dimension_numbers<[1], [0], [0], [1], [0, 0, 1, 1], [], []>} : vector<2x32xf32>, vector<32x128xf32>, vector<2x128xf32> -> vector<2x128xf32>
    %116 = arith.addf %113, %115 : vector<2x128xf32>
    %117 = vector.extract_strided_slice %116 {offsets = [0, 0], sizes = [2, 96], strides = [1, 1]} : vector<2x128xf32> to vector<2x96xf32>
    %118 = arith.negf %117 : vector<2x96xf32>
    %119 = math.exp %118 : vector<2x96xf32>
    %cst_46 = arith.constant 1.000000e+00 : f32
    %120 = vector.broadcast %cst_46 : f32 to vector<2x96xf32>
    %121 = arith.addf %120, %119 : vector<2x96xf32>
    %122 = arith.divf %120, %121 : vector<2x96xf32>
    %123 = vector.extract_strided_slice %116 {offsets = [0, 96], sizes = [2, 32], strides = [1, 1]} : vector<2x128xf32> to vector<2x32xf32>
    %124 = math.tanh %123 : vector<2x32xf32>
    %125 = vector.extract_strided_slice %122 {offsets = [0, 0], sizes = [2, 32], strides = [1, 1]} : vector<2x96xf32> to vector<2x32xf32>
    %126 = vector.extract_strided_slice %122 {offsets = [0, 32], sizes = [2, 32], strides = [1, 1]} : vector<2x96xf32> to vector<2x32xf32>
    %127 = vector.extract_strided_slice %122 {offsets = [0, 64], sizes = [2, 32], strides = [1, 1]} : vector<2x96xf32> to vector<2x32xf32>
    %128 = arith.mulf %126, %103 : vector<2x32xf32>
    %129 = arith.mulf %125, %124 : vector<2x32xf32>
    %130 = arith.addf %128, %129 : vector<2x32xf32>
    %131 = math.tanh %130 : vector<2x32xf32>
    %132 = arith.mulf %127, %131 : vector<2x32xf32>
    %133 = math.tanh %132 : vector<2x32xf32>
    %134 = arith.index_cast %c2_i32 : i32 to index
    %c0_47 = arith.constant 0 : index
    %c0_48 = arith.constant 0 : index
    %135 = vector.load %arg13[%134, %c0_47, %c0_48] : memref<8x2x32xf32, #tpu.memory_space<vmem>>, vector<1x2x32xf32>
    %136 = vector.shape_cast %135 : vector<1x2x32xf32> to vector<2x32xf32>
    %137 = vector.shape_cast %133 : vector<2x32xf32> to vector<1x2x32xf32>
    tpu.vector_store %arg13[%134, %c0_47, %c0_48], %137 {strides = array<i32>} : memref<8x2x32xf32, #tpu.memory_space<vmem>>, vector<1x2x32xf32>,
    %c3_i32 = arith.constant 3 : i32
    %138 = arith.index_cast %c3_i32 : i32 to index
    %c0_49 = arith.constant 0 : index
    %c0_50 = arith.constant 0 : index
    %139 = vector.load %arg12[%138, %c0_49, %c0_50] : memref<8x2x128xf32, #tpu.memory_space<vmem>>, vector<1x2x128xf32>
    %140 = vector.shape_cast %139 : vector<1x2x128xf32> to vector<2x128xf32>
    %c0_51 = arith.constant 0 : index
    %c0_52 = arith.constant 0 : index
    %141 = vector.load %arg2[%c0_51, %c0_52] : memref<32x128xf32, #tpu.memory_space<vmem>>, vector<32x128xf32>
    %cst_53 = arith.constant dense<0.000000e+00> : vector<2x128xf32>
    %142 = tpu.matmul %132, %141, %cst_53 {dimension_numbers = #tpu.dot_dimension_numbers<[1], [0], [0], [1], [0, 0, 1, 1], [], []>} : vector<2x32xf32>, vector<32x128xf32>, vector<2x128xf32> -> vector<2x128xf32>
    %143 = arith.addf %140, %142 : vector<2x128xf32>
    %144 = vector.extract_strided_slice %143 {offsets = [0, 0], sizes = [2, 96], strides = [1, 1]} : vector<2x128xf32> to vector<2x96xf32>
    %145 = arith.negf %144 : vector<2x96xf32>
    %146 = math.exp %145 : vector<2x96xf32>
    %cst_54 = arith.constant 1.000000e+00 : f32
    %147 = vector.broadcast %cst_54 : f32 to vector<2x96xf32>
    %148 = arith.addf %147, %146 : vector<2x96xf32>
    %149 = arith.divf %147, %148 : vector<2x96xf32>
    %150 = vector.extract_strided_slice %143 {offsets = [0, 96], sizes = [2, 32], strides = [1, 1]} : vector<2x128xf32> to vector<2x32xf32>
    %151 = math.tanh %150 : vector<2x32xf32>
    %152 = vector.extract_strided_slice %149 {offsets = [0, 0], sizes = [2, 32], strides = [1, 1]} : vector<2x96xf32> to vector<2x32xf32>
    %153 = vector.extract_strided_slice %149 {offsets = [0, 32], sizes = [2, 32], strides = [1, 1]} : vector<2x96xf32> to vector<2x32xf32>
    %154 = vector.extract_strided_slice %149 {offsets = [0, 64], sizes = [2, 32], strides = [1, 1]} : vector<2x96xf32> to vector<2x32xf32>
    %155 = arith.mulf %153, %130 : vector<2x32xf32>
    %156 = arith.mulf %152, %151 : vector<2x32xf32>
    %157 = arith.addf %155, %156 : vector<2x32xf32>
    %158 = math.tanh %157 : vector<2x32xf32>
    %159 = arith.mulf %154, %158 : vector<2x32xf32>
    %160 = math.tanh %159 : vector<2x32xf32>
    %161 = arith.index_cast %c3_i32 : i32 to index
    %c0_55 = arith.constant 0 : index
    %c0_56 = arith.constant 0 : index
    %162 = vector.load %arg13[%161, %c0_55, %c0_56] : memref<8x2x32xf32, #tpu.memory_space<vmem>>, vector<1x2x32xf32>
    %163 = vector.shape_cast %162 : vector<1x2x32xf32> to vector<2x32xf32>
    %164 = vector.shape_cast %160 : vector<2x32xf32> to vector<1x2x32xf32>
    tpu.vector_store %arg13[%161, %c0_55, %c0_56], %164 {strides = array<i32>} : memref<8x2x32xf32, #tpu.memory_space<vmem>>, vector<1x2x32xf32>,
    %c4_i32 = arith.constant 4 : i32
    %165 = arith.index_cast %c4_i32 : i32 to index
    %c0_57 = arith.constant 0 : index
    %c0_58 = arith.constant 0 : index
    %166 = vector.load %arg12[%165, %c0_57, %c0_58] : memref<8x2x128xf32, #tpu.memory_space<vmem>>, vector<1x2x128xf32>
    %167 = vector.shape_cast %166 : vector<1x2x128xf32> to vector<2x128xf32>
    %c0_59 = arith.constant 0 : index
    %c0_60 = arith.constant 0 : index
    %168 = vector.load %arg2[%c0_59, %c0_60] : memref<32x128xf32, #tpu.memory_space<vmem>>, vector<32x128xf32>
    %cst_61 = arith.constant dense<0.000000e+00> : vector<2x128xf32>
    %169 = tpu.matmul %159, %168, %cst_61 {dimension_numbers = #tpu.dot_dimension_numbers<[1], [0], [0], [1], [0, 0, 1, 1], [], []>} : vector<2x32xf32>, vector<32x128xf32>, vector<2x128xf32> -> vector<2x128xf32>
    %170 = arith.addf %167, %169 : vector<2x128xf32>
    %171 = vector.extract_strided_slice %170 {offsets = [0, 0], sizes = [2, 96], strides = [1, 1]} : vector<2x128xf32> to vector<2x96xf32>
    %172 = arith.negf %171 : vector<2x96xf32>
    %173 = math.exp %172 : vector<2x96xf32>
    %cst_62 = arith.constant 1.000000e+00 : f32
    %174 = vector.broadcast %cst_62 : f32 to vector<2x96xf32>
    %175 = arith.addf %174, %173 : vector<2x96xf32>
    %176 = arith.divf %174, %175 : vector<2x96xf32>
    %177 = vector.extract_strided_slice %170 {offsets = [0, 96], sizes = [2, 32], strides = [1, 1]} : vector<2x128xf32> to vector<2x32xf32>
    %178 = math.tanh %177 : vector<2x32xf32>
    %179 = vector.extract_strided_slice %176 {offsets = [0, 0], sizes = [2, 32], strides = [1, 1]} : vector<2x96xf32> to vector<2x32xf32>
    %180 = vector.extract_strided_slice %176 {offsets = [0, 32], sizes = [2, 32], strides = [1, 1]} : vector<2x96xf32> to vector<2x32xf32>
    %181 = vector.extract_strided_slice %176 {offsets = [0, 64], sizes = [2, 32], strides = [1, 1]} : vector<2x96xf32> to vector<2x32xf32>
    %182 = arith.mulf %180, %157 : vector<2x32xf32>
    %183 = arith.mulf %179, %178 : vector<2x32xf32>
    %184 = arith.addf %182, %183 : vector<2x32xf32>
    %185 = math.tanh %184 : vector<2x32xf32>
    %186 = arith.mulf %181, %185 : vector<2x32xf32>
    %187 = math.tanh %186 : vector<2x32xf32>
    %188 = arith.index_cast %c4_i32 : i32 to index
    %c0_63 = arith.constant 0 : index
    %c0_64 = arith.constant 0 : index
    %189 = vector.load %arg13[%188, %c0_63, %c0_64] : memref<8x2x32xf32, #tpu.memory_space<vmem>>, vector<1x2x32xf32>
    %190 = vector.shape_cast %189 : vector<1x2x32xf32> to vector<2x32xf32>
    %191 = vector.shape_cast %187 : vector<2x32xf32> to vector<1x2x32xf32>
    tpu.vector_store %arg13[%188, %c0_63, %c0_64], %191 {strides = array<i32>} : memref<8x2x32xf32, #tpu.memory_space<vmem>>, vector<1x2x32xf32>,
    %c5_i32 = arith.constant 5 : i32
    %192 = arith.index_cast %c5_i32 : i32 to index
    %c0_65 = arith.constant 0 : index
    %c0_66 = arith.constant 0 : index
    %193 = vector.load %arg12[%192, %c0_65, %c0_66] : memref<8x2x128xf32, #tpu.memory_space<vmem>>, vector<1x2x128xf32>
    %194 = vector.shape_cast %193 : vector<1x2x128xf32> to vector<2x128xf32>
    %c0_67 = arith.constant 0 : index
    %c0_68 = arith.constant 0 : index
    %195 = vector.load %arg2[%c0_67, %c0_68] : memref<32x128xf32, #tpu.memory_space<vmem>>, vector<32x128xf32>
    %cst_69 = arith.constant dense<0.000000e+00> : vector<2x128xf32>
    %196 = tpu.matmul %186, %195, %cst_69 {dimension_numbers = #tpu.dot_dimension_numbers<[1], [0], [0], [1], [0, 0, 1, 1], [], []>} : vector<2x32xf32>, vector<32x128xf32>, vector<2x128xf32> -> vector<2x128xf32>
    %197 = arith.addf %194, %196 : vector<2x128xf32>
    %198 = vector.extract_strided_slice %197 {offsets = [0, 0], sizes = [2, 96], strides = [1, 1]} : vector<2x128xf32> to vector<2x96xf32>
    %199 = arith.negf %198 : vector<2x96xf32>
    %200 = math.exp %199 : vector<2x96xf32>
    %cst_70 = arith.constant 1.000000e+00 : f32
    %201 = vector.broadcast %cst_70 : f32 to vector<2x96xf32>
    %202 = arith.addf %201, %200 : vector<2x96xf32>
    %203 = arith.divf %201, %202 : vector<2x96xf32>
    %204 = vector.extract_strided_slice %197 {offsets = [0, 96], sizes = [2, 32], strides = [1, 1]} : vector<2x128xf32> to vector<2x32xf32>
    %205 = math.tanh %204 : vector<2x32xf32>
    %206 = vector.extract_strided_slice %203 {offsets = [0, 0], sizes = [2, 32], strides = [1, 1]} : vector<2x96xf32> to vector<2x32xf32>
    %207 = vector.extract_strided_slice %203 {offsets = [0, 32], sizes = [2, 32], strides = [1, 1]} : vector<2x96xf32> to vector<2x32xf32>
    %208 = vector.extract_strided_slice %203 {offsets = [0, 64], sizes = [2, 32], strides = [1, 1]} : vector<2x96xf32> to vector<2x32xf32>
    %209 = arith.mulf %207, %184 : vector<2x32xf32>
    %210 = arith.mulf %206, %205 : vector<2x32xf32>
    %211 = arith.addf %209, %210 : vector<2x32xf32>
    %212 = math.tanh %211 : vector<2x32xf32>
    %213 = arith.mulf %208, %212 : vector<2x32xf32>
    %214 = math.tanh %213 : vector<2x32xf32>
    %215 = arith.index_cast %c5_i32 : i32 to index
    %c0_71 = arith.constant 0 : index
    %c0_72 = arith.constant 0 : index
    %216 = vector.load %arg13[%215, %c0_71, %c0_72] : memref<8x2x32xf32, #tpu.memory_space<vmem>>, vector<1x2x32xf32>
    %217 = vector.shape_cast %216 : vector<1x2x32xf32> to vector<2x32xf32>
    %218 = vector.shape_cast %214 : vector<2x32xf32> to vector<1x2x32xf32>
    tpu.vector_store %arg13[%215, %c0_71, %c0_72], %218 {strides = array<i32>} : memref<8x2x32xf32, #tpu.memory_space<vmem>>, vector<1x2x32xf32>,
    %c6_i32 = arith.constant 6 : i32
    %219 = arith.index_cast %c6_i32 : i32 to index
    %c0_73 = arith.constant 0 : index
    %c0_74 = arith.constant 0 : index
    %220 = vector.load %arg12[%219, %c0_73, %c0_74] : memref<8x2x128xf32, #tpu.memory_space<vmem>>, vector<1x2x128xf32>
    %221 = vector.shape_cast %220 : vector<1x2x128xf32> to vector<2x128xf32>
    %c0_75 = arith.constant 0 : index
    %c0_76 = arith.constant 0 : index
    %222 = vector.load %arg2[%c0_75, %c0_76] : memref<32x128xf32, #tpu.memory_space<vmem>>, vector<32x128xf32>
    %cst_77 = arith.constant dense<0.000000e+00> : vector<2x128xf32>
    %223 = tpu.matmul %213, %222, %cst_77 {dimension_numbers = #tpu.dot_dimension_numbers<[1], [0], [0], [1], [0, 0, 1, 1], [], []>} : vector<2x32xf32>, vector<32x128xf32>, vector<2x128xf32> -> vector<2x128xf32>
    %224 = arith.addf %221, %223 : vector<2x128xf32>
    %225 = vector.extract_strided_slice %224 {offsets = [0, 0], sizes = [2, 96], strides = [1, 1]} : vector<2x128xf32> to vector<2x96xf32>
    %226 = arith.negf %225 : vector<2x96xf32>
    %227 = math.exp %226 : vector<2x96xf32>
    %cst_78 = arith.constant 1.000000e+00 : f32
    %228 = vector.broadcast %cst_78 : f32 to vector<2x96xf32>
    %229 = arith.addf %228, %227 : vector<2x96xf32>
    %230 = arith.divf %228, %229 : vector<2x96xf32>
    %231 = vector.extract_strided_slice %224 {offsets = [0, 96], sizes = [2, 32], strides = [1, 1]} : vector<2x128xf32> to vector<2x32xf32>
    %232 = math.tanh %231 : vector<2x32xf32>
    %233 = vector.extract_strided_slice %230 {offsets = [0, 0], sizes = [2, 32], strides = [1, 1]} : vector<2x96xf32> to vector<2x32xf32>
    %234 = vector.extract_strided_slice %230 {offsets = [0, 32], sizes = [2, 32], strides = [1, 1]} : vector<2x96xf32> to vector<2x32xf32>
    %235 = vector.extract_strided_slice %230 {offsets = [0, 64], sizes = [2, 32], strides = [1, 1]} : vector<2x96xf32> to vector<2x32xf32>
    %236 = arith.mulf %234, %211 : vector<2x32xf32>
    %237 = arith.mulf %233, %232 : vector<2x32xf32>
    %238 = arith.addf %236, %237 : vector<2x32xf32>
    %239 = math.tanh %238 : vector<2x32xf32>
    %240 = arith.mulf %235, %239 : vector<2x32xf32>
    %241 = math.tanh %240 : vector<2x32xf32>
    %242 = arith.index_cast %c6_i32 : i32 to index
    %c0_79 = arith.constant 0 : index
    %c0_80 = arith.constant 0 : index
    %243 = vector.load %arg13[%242, %c0_79, %c0_80] : memref<8x2x32xf32, #tpu.memory_space<vmem>>, vector<1x2x32xf32>
    %244 = vector.shape_cast %243 : vector<1x2x32xf32> to vector<2x32xf32>
    %245 = vector.shape_cast %241 : vector<2x32xf32> to vector<1x2x32xf32>
    tpu.vector_store %arg13[%242, %c0_79, %c0_80], %245 {strides = array<i32>} : memref<8x2x32xf32, #tpu.memory_space<vmem>>, vector<1x2x32xf32>,
    %c7_i32 = arith.constant 7 : i32
    %246 = arith.index_cast %c7_i32 : i32 to index
    %c0_81 = arith.constant 0 : index
    %c0_82 = arith.constant 0 : index
    %247 = vector.load %arg12[%246, %c0_81, %c0_82] : memref<8x2x128xf32, #tpu.memory_space<vmem>>, vector<1x2x128xf32>
    %248 = vector.shape_cast %247 : vector<1x2x128xf32> to vector<2x128xf32>
    %c0_83 = arith.constant 0 : index
    %c0_84 = arith.constant 0 : index
    %249 = vector.load %arg2[%c0_83, %c0_84] : memref<32x128xf32, #tpu.memory_space<vmem>>, vector<32x128xf32>
    %cst_85 = arith.constant dense<0.000000e+00> : vector<2x128xf32>
    %250 = tpu.matmul %240, %249, %cst_85 {dimension_numbers = #tpu.dot_dimension_numbers<[1], [0], [0], [1], [0, 0, 1, 1], [], []>} : vector<2x32xf32>, vector<32x128xf32>, vector<2x128xf32> -> vector<2x128xf32>
    %251 = arith.addf %248, %250 : vector<2x128xf32>
    %252 = vector.extract_strided_slice %251 {offsets = [0, 0], sizes = [2, 96], strides = [1, 1]} : vector<2x128xf32> to vector<2x96xf32>
    %253 = arith.negf %252 : vector<2x96xf32>
    %254 = math.exp %253 : vector<2x96xf32>
    %cst_86 = arith.constant 1.000000e+00 : f32
    %255 = vector.broadcast %cst_86 : f32 to vector<2x96xf32>
    %256 = arith.addf %255, %254 : vector<2x96xf32>
    %257 = arith.divf %255, %256 : vector<2x96xf32>
    %258 = vector.extract_strided_slice %251 {offsets = [0, 96], sizes = [2, 32], strides = [1, 1]} : vector<2x128xf32> to vector<2x32xf32>
    %259 = math.tanh %258 : vector<2x32xf32>
    %260 = vector.extract_strided_slice %257 {offsets = [0, 0], sizes = [2, 32], strides = [1, 1]} : vector<2x96xf32> to vector<2x32xf32>
    %261 = vector.extract_strided_slice %257 {offsets = [0, 32], sizes = [2, 32], strides = [1, 1]} : vector<2x96xf32> to vector<2x32xf32>
    %262 = vector.extract_strided_slice %257 {offsets = [0, 64], sizes = [2, 32], strides = [1, 1]} : vector<2x96xf32> to vector<2x32xf32>
    %263 = arith.mulf %261, %238 : vector<2x32xf32>
    %264 = arith.mulf %260, %259 : vector<2x32xf32>
    %265 = arith.addf %263, %264 : vector<2x32xf32>
    %266 = math.tanh %265 : vector<2x32xf32>
    %267 = arith.mulf %262, %266 : vector<2x32xf32>
    %268 = math.tanh %267 : vector<2x32xf32>
    %269 = arith.index_cast %c7_i32 : i32 to index
    %c0_87 = arith.constant 0 : index
    %c0_88 = arith.constant 0 : index
    %270 = vector.load %arg13[%269, %c0_87, %c0_88] : memref<8x2x32xf32, #tpu.memory_space<vmem>>, vector<1x2x32xf32>
    %271 = vector.shape_cast %270 : vector<1x2x32xf32> to vector<2x32xf32>
    %272 = vector.shape_cast %268 : vector<2x32xf32> to vector<1x2x32xf32>
    tpu.vector_store %arg13[%269, %c0_87, %c0_88], %272 {strides = array<i32>} : memref<8x2x32xf32, #tpu.memory_space<vmem>>, vector<1x2x32xf32>,
    %c8_i32 = arith.constant 8 : i32
    %c0_89 = arith.constant 0 : index
    %c0_90 = arith.constant 0 : index
    %c0_91 = arith.constant 0 : index
    %273 = vector.load %arg13[%c0_89, %c0_90, %c0_91] : memref<8x2x32xf32, #tpu.memory_space<vmem>>, vector<1x2x32xf32>
    %274 = vector.shape_cast %273 : vector<1x2x32xf32> to vector<2x32xf32>
    %c1_92 = arith.constant 1 : index
    %c0_93 = arith.constant 0 : index
    %c0_94 = arith.constant 0 : index
    %275 = vector.load %arg13[%c1_92, %c0_93, %c0_94] : memref<8x2x32xf32, #tpu.memory_space<vmem>>, vector<1x2x32xf32>
    %276 = vector.shape_cast %275 : vector<1x2x32xf32> to vector<2x32xf32>
    %c2_95 = arith.constant 2 : index
    %c0_96 = arith.constant 0 : index
    %c0_97 = arith.constant 0 : index
    %277 = vector.load %arg13[%c2_95, %c0_96, %c0_97] : memref<8x2x32xf32, #tpu.memory_space<vmem>>, vector<1x2x32xf32>
    %278 = vector.shape_cast %277 : vector<1x2x32xf32> to vector<2x32xf32>
    %c3_98 = arith.constant 3 : index
    %c0_99 = arith.constant 0 : index
    %c0_100 = arith.constant 0 : index
    %279 = vector.load %arg13[%c3_98, %c0_99, %c0_100] : memref<8x2x32xf32, #tpu.memory_space<vmem>>, vector<1x2x32xf32>
    %280 = vector.shape_cast %279 : vector<1x2x32xf32> to vector<2x32xf32>
    %c4_101 = arith.constant 4 : index
    %c0_102 = arith.constant 0 : index
    %c0_103 = arith.constant 0 : index
    %281 = vector.load %arg13[%c4_101, %c0_102, %c0_103] : memref<8x2x32xf32, #tpu.memory_space<vmem>>, vector<1x2x32xf32>
    %282 = vector.shape_cast %281 : vector<1x2x32xf32> to vector<2x32xf32>
    %c5_104 = arith.constant 5 : index
    %c0_105 = arith.constant 0 : index
    %c0_106 = arith.constant 0 : index
    %283 = vector.load %arg13[%c5_104, %c0_105, %c0_106] : memref<8x2x32xf32, #tpu.memory_space<vmem>>, vector<1x2x32xf32>
    %284 = vector.shape_cast %283 : vector<1x2x32xf32> to vector<2x32xf32>
    %c6_107 = arith.constant 6 : index
    %c0_108 = arith.constant 0 : index
    %c0_109 = arith.constant 0 : index
    %285 = vector.load %arg13[%c6_107, %c0_108, %c0_109] : memref<8x2x32xf32, #tpu.memory_space<vmem>>, vector<1x2x32xf32>
    %286 = vector.shape_cast %285 : vector<1x2x32xf32> to vector<2x32xf32>
    %c7_110 = arith.constant 7 : index
    %c0_111 = arith.constant 0 : index
    %c0_112 = arith.constant 0 : index
    %287 = vector.load %arg13[%c7_110, %c0_111, %c0_112] : memref<8x2x32xf32, #tpu.memory_space<vmem>>, vector<1x2x32xf32>
    %288 = vector.shape_cast %287 : vector<1x2x32xf32> to vector<2x32xf32>
    %289 = tpu.concatenate %274, %276, %278, %280, %282, %284, %286, %288 in 0 : vector<2x32xf32>, vector<2x32xf32>, vector<2x32xf32>, vector<2x32xf32>, vector<2x32xf32>, vector<2x32xf32>, vector<2x32xf32>, vector<2x32xf32> -> vector<16x32xf32>
    %c0_113 = arith.constant 0 : index
    %c0_114 = arith.constant 0 : index
    %290 = vector.load %arg4[%c0_113, %c0_114] : memref<32x128xf32, #tpu.memory_space<vmem>>, vector<32x128xf32>
    %cst_115 = arith.constant dense<0.000000e+00> : vector<16x128xf32>
    %291 = tpu.matmul %289, %290, %cst_115 {dimension_numbers = #tpu.dot_dimension_numbers<[1], [0], [0], [1], [0, 0, 1, 1], [], []>} : vector<16x32xf32>, vector<32x128xf32>, vector<16x128xf32> -> vector<16x128xf32>
    %c0_116 = arith.constant 0 : index
    %c0_117 = arith.constant 0 : index
    %292 = vector.load %arg6[%c0_116, %c0_117] : memref<1x128xf32, #tpu.memory_space<vmem>>, vector<1x128xf32>
    %293 = vector.broadcast %292 : vector<1x128xf32> to vector<16x128xf32>
    %294 = arith.addf %291, %293 : vector<16x128xf32>
    %295 = vector.extract_strided_slice %294 {offsets = [0, 0], sizes = [2, 128], strides = [1, 1]} : vector<16x128xf32> to vector<2x128xf32>
    %c0_118 = arith.constant 0 : index
    %c0_119 = arith.constant 0 : index
    %c0_120 = arith.constant 0 : index
    %296 = vector.load %arg12[%c0_118, %c0_119, %c0_120] : memref<8x2x128xf32, #tpu.memory_space<vmem>>, vector<1x2x128xf32>
    %297 = vector.shape_cast %296 : vector<1x2x128xf32> to vector<2x128xf32>
    %298 = vector.shape_cast %295 : vector<2x128xf32> to vector<1x2x128xf32>
    tpu.vector_store %arg12[%c0_118, %c0_119, %c0_120], %298 {strides = array<i32>} : memref<8x2x128xf32, #tpu.memory_space<vmem>>, vector<1x2x128xf32>,
    %299 = vector.extract_strided_slice %294 {offsets = [2, 0], sizes = [2, 128], strides = [1, 1]} : vector<16x128xf32> to vector<2x128xf32>
    %c1_121 = arith.constant 1 : index
    %c0_122 = arith.constant 0 : index
    %c0_123 = arith.constant 0 : index
    %300 = vector.load %arg12[%c1_121, %c0_122, %c0_123] : memref<8x2x128xf32, #tpu.memory_space<vmem>>, vector<1x2x128xf32>
    %301 = vector.shape_cast %300 : vector<1x2x128xf32> to vector<2x128xf32>
    %302 = vector.shape_cast %299 : vector<2x128xf32> to vector<1x2x128xf32>
    tpu.vector_store %arg12[%c1_121, %c0_122, %c0_123], %302 {strides = array<i32>} : memref<8x2x128xf32, #tpu.memory_space<vmem>>, vector<1x2x128xf32>,
    %303 = vector.extract_strided_slice %294 {offsets = [4, 0], sizes = [2, 128], strides = [1, 1]} : vector<16x128xf32> to vector<2x128xf32>
    %c2_124 = arith.constant 2 : index
    %c0_125 = arith.constant 0 : index
    %c0_126 = arith.constant 0 : index
    %304 = vector.load %arg12[%c2_124, %c0_125, %c0_126] : memref<8x2x128xf32, #tpu.memory_space<vmem>>, vector<1x2x128xf32>
    %305 = vector.shape_cast %304 : vector<1x2x128xf32> to vector<2x128xf32>
    %306 = vector.shape_cast %303 : vector<2x128xf32> to vector<1x2x128xf32>
    tpu.vector_store %arg12[%c2_124, %c0_125, %c0_126], %306 {strides = array<i32>} : memref<8x2x128xf32, #tpu.memory_space<vmem>>, vector<1x2x128xf32>,
    %307 = vector.extract_strided_slice %294 {offsets = [6, 0], sizes = [2, 128], strides = [1, 1]} : vector<16x128xf32> to vector<2x128xf32>
    %c3_127 = arith.constant 3 : index
    %c0_128 = arith.constant 0 : index
    %c0_129 = arith.constant 0 : index
    %308 = vector.load %arg12[%c3_127, %c0_128, %c0_129] : memref<8x2x128xf32, #tpu.memory_space<vmem>>, vector<1x2x128xf32>
    %309 = vector.shape_cast %308 : vector<1x2x128xf32> to vector<2x128xf32>
    %310 = vector.shape_cast %307 : vector<2x128xf32> to vector<1x2x128xf32>
    tpu.vector_store %arg12[%c3_127, %c0_128, %c0_129], %310 {strides = array<i32>} : memref<8x2x128xf32, #tpu.memory_space<vmem>>, vector<1x2x128xf32>,
    %311 = vector.extract_strided_slice %294 {offsets = [8, 0], sizes = [2, 128], strides = [1, 1]} : vector<16x128xf32> to vector<2x128xf32>
    %c4_130 = arith.constant 4 : index
    %c0_131 = arith.constant 0 : index
    %c0_132 = arith.constant 0 : index
    %312 = vector.load %arg12[%c4_130, %c0_131, %c0_132] : memref<8x2x128xf32, #tpu.memory_space<vmem>>, vector<1x2x128xf32>
    %313 = vector.shape_cast %312 : vector<1x2x128xf32> to vector<2x128xf32>
    %314 = vector.shape_cast %311 : vector<2x128xf32> to vector<1x2x128xf32>
    tpu.vector_store %arg12[%c4_130, %c0_131, %c0_132], %314 {strides = array<i32>} : memref<8x2x128xf32, #tpu.memory_space<vmem>>, vector<1x2x128xf32>,
    %315 = vector.extract_strided_slice %294 {offsets = [10, 0], sizes = [2, 128], strides = [1, 1]} : vector<16x128xf32> to vector<2x128xf32>
    %c5_133 = arith.constant 5 : index
    %c0_134 = arith.constant 0 : index
    %c0_135 = arith.constant 0 : index
    %316 = vector.load %arg12[%c5_133, %c0_134, %c0_135] : memref<8x2x128xf32, #tpu.memory_space<vmem>>, vector<1x2x128xf32>
    %317 = vector.shape_cast %316 : vector<1x2x128xf32> to vector<2x128xf32>
    %318 = vector.shape_cast %315 : vector<2x128xf32> to vector<1x2x128xf32>
    tpu.vector_store %arg12[%c5_133, %c0_134, %c0_135], %318 {strides = array<i32>} : memref<8x2x128xf32, #tpu.memory_space<vmem>>, vector<1x2x128xf32>,
    %319 = vector.extract_strided_slice %294 {offsets = [12, 0], sizes = [2, 128], strides = [1, 1]} : vector<16x128xf32> to vector<2x128xf32>
    %c6_136 = arith.constant 6 : index
    %c0_137 = arith.constant 0 : index
    %c0_138 = arith.constant 0 : index
    %320 = vector.load %arg12[%c6_136, %c0_137, %c0_138] : memref<8x2x128xf32, #tpu.memory_space<vmem>>, vector<1x2x128xf32>
    %321 = vector.shape_cast %320 : vector<1x2x128xf32> to vector<2x128xf32>
    %322 = vector.shape_cast %319 : vector<2x128xf32> to vector<1x2x128xf32>
    tpu.vector_store %arg12[%c6_136, %c0_137, %c0_138], %322 {strides = array<i32>} : memref<8x2x128xf32, #tpu.memory_space<vmem>>, vector<1x2x128xf32>,
    %323 = vector.extract_strided_slice %294 {offsets = [14, 0], sizes = [2, 128], strides = [1, 1]} : vector<16x128xf32> to vector<2x128xf32>
    %c7_139 = arith.constant 7 : index
    %c0_140 = arith.constant 0 : index
    %c0_141 = arith.constant 0 : index
    %324 = vector.load %arg12[%c7_139, %c0_140, %c0_141] : memref<8x2x128xf32, #tpu.memory_space<vmem>>, vector<1x2x128xf32>
    %325 = vector.shape_cast %324 : vector<1x2x128xf32> to vector<2x128xf32>
    %326 = vector.shape_cast %323 : vector<2x128xf32> to vector<1x2x128xf32>
    tpu.vector_store %arg12[%c7_139, %c0_140, %c0_141], %326 {strides = array<i32>} : memref<8x2x128xf32, #tpu.memory_space<vmem>>, vector<1x2x128xf32>,
    %cst_142 = arith.constant 0.000000e+00 : f32
    %327 = vector.broadcast %cst_142 : f32 to vector<2x32xf32>
    %cst_143 = arith.constant 0.000000e+00 : f32
    %328 = vector.broadcast %cst_143 : f32 to vector<2x32xf32>
    %c0_i32_144 = arith.constant 0 : i32
    %329 = arith.index_cast %c0_i32_144 : i32 to index
    %c0_145 = arith.constant 0 : index
    %c0_146 = arith.constant 0 : index
    %330 = vector.load %arg12[%329, %c0_145, %c0_146] : memref<8x2x128xf32, #tpu.memory_space<vmem>>, vector<1x2x128xf32>
    %331 = vector.shape_cast %330 : vector<1x2x128xf32> to vector<2x128xf32>
    %c0_147 = arith.constant 0 : index
    %c0_148 = arith.constant 0 : index
    %332 = vector.load %arg5[%c0_147, %c0_148] : memref<32x128xf32, #tpu.memory_space<vmem>>, vector<32x128xf32>
    %cst_149 = arith.constant dense<0.000000e+00> : vector<2x128xf32>
    %333 = tpu.matmul %327, %332, %cst_149 {dimension_numbers = #tpu.dot_dimension_numbers<[1], [0], [0], [1], [0, 0, 1, 1], [], []>} : vector<2x32xf32>, vector<32x128xf32>, vector<2x128xf32> -> vector<2x128xf32>
    %334 = arith.addf %331, %333 : vector<2x128xf32>
    %335 = vector.extract_strided_slice %334 {offsets = [0, 0], sizes = [2, 96], strides = [1, 1]} : vector<2x128xf32> to vector<2x96xf32>
    %336 = arith.negf %335 : vector<2x96xf32>
    %337 = math.exp %336 : vector<2x96xf32>
    %cst_150 = arith.constant 1.000000e+00 : f32
    %338 = vector.broadcast %cst_150 : f32 to vector<2x96xf32>
    %339 = arith.addf %338, %337 : vector<2x96xf32>
    %340 = arith.divf %338, %339 : vector<2x96xf32>
    %341 = vector.extract_strided_slice %334 {offsets = [0, 96], sizes = [2, 32], strides = [1, 1]} : vector<2x128xf32> to vector<2x32xf32>
    %342 = math.tanh %341 : vector<2x32xf32>
    %343 = vector.extract_strided_slice %340 {offsets = [0, 0], sizes = [2, 32], strides = [1, 1]} : vector<2x96xf32> to vector<2x32xf32>
    %344 = vector.extract_strided_slice %340 {offsets = [0, 32], sizes = [2, 32], strides = [1, 1]} : vector<2x96xf32> to vector<2x32xf32>
    %345 = vector.extract_strided_slice %340 {offsets = [0, 64], sizes = [2, 32], strides = [1, 1]} : vector<2x96xf32> to vector<2x32xf32>
    %346 = arith.mulf %344, %328 : vector<2x32xf32>
    %347 = arith.mulf %343, %342 : vector<2x32xf32>
    %348 = arith.addf %346, %347 : vector<2x32xf32>
    %349 = math.tanh %348 : vector<2x32xf32>
    %350 = arith.mulf %345, %349 : vector<2x32xf32>
    %351 = math.tanh %350 : vector<2x32xf32>
    %352 = arith.index_cast %c0_i32_144 : i32 to index
    %c0_151 = arith.constant 0 : index
    %c0_152 = arith.constant 0 : index
    %353 = vector.load %arg13[%352, %c0_151, %c0_152] : memref<8x2x32xf32, #tpu.memory_space<vmem>>, vector<1x2x32xf32>
    %354 = vector.shape_cast %353 : vector<1x2x32xf32> to vector<2x32xf32>
    %355 = vector.shape_cast %351 : vector<2x32xf32> to vector<1x2x32xf32>
    tpu.vector_store %arg13[%352, %c0_151, %c0_152], %355 {strides = array<i32>} : memref<8x2x32xf32, #tpu.memory_space<vmem>>, vector<1x2x32xf32>,
    %c1_i32_153 = arith.constant 1 : i32
    %356 = arith.index_cast %c1_i32_153 : i32 to index
    %c0_154 = arith.constant 0 : index
    %c0_155 = arith.constant 0 : index
    %357 = vector.load %arg12[%356, %c0_154, %c0_155] : memref<8x2x128xf32, #tpu.memory_space<vmem>>, vector<1x2x128xf32>
    %358 = vector.shape_cast %357 : vector<1x2x128xf32> to vector<2x128xf32>
    %c0_156 = arith.constant 0 : index
    %c0_157 = arith.constant 0 : index
    %359 = vector.load %arg5[%c0_156, %c0_157] : memref<32x128xf32, #tpu.memory_space<vmem>>, vector<32x128xf32>
    %cst_158 = arith.constant dense<0.000000e+00> : vector<2x128xf32>
    %360 = tpu.matmul %350, %359, %cst_158 {dimension_numbers = #tpu.dot_dimension_numbers<[1], [0], [0], [1], [0, 0, 1, 1], [], []>} : vector<2x32xf32>, vector<32x128xf32>, vector<2x128xf32> -> vector<2x128xf32>
    %361 = arith.addf %358, %360 : vector<2x128xf32>
    %362 = vector.extract_strided_slice %361 {offsets = [0, 0], sizes = [2, 96], strides = [1, 1]} : vector<2x128xf32> to vector<2x96xf32>
    %363 = arith.negf %362 : vector<2x96xf32>
    %364 = math.exp %363 : vector<2x96xf32>
    %cst_159 = arith.constant 1.000000e+00 : f32
    %365 = vector.broadcast %cst_159 : f32 to vector<2x96xf32>
    %366 = arith.addf %365, %364 : vector<2x96xf32>
    %367 = arith.divf %365, %366 : vector<2x96xf32>
    %368 = vector.extract_strided_slice %361 {offsets = [0, 96], sizes = [2, 32], strides = [1, 1]} : vector<2x128xf32> to vector<2x32xf32>
    %369 = math.tanh %368 : vector<2x32xf32>
    %370 = vector.extract_strided_slice %367 {offsets = [0, 0], sizes = [2, 32], strides = [1, 1]} : vector<2x96xf32> to vector<2x32xf32>
    %371 = vector.extract_strided_slice %367 {offsets = [0, 32], sizes = [2, 32], strides = [1, 1]} : vector<2x96xf32> to vector<2x32xf32>
    %372 = vector.extract_strided_slice %367 {offsets = [0, 64], sizes = [2, 32], strides = [1, 1]} : vector<2x96xf32> to vector<2x32xf32>
    %373 = arith.mulf %371, %348 : vector<2x32xf32>
    %374 = arith.mulf %370, %369 : vector<2x32xf32>
    %375 = arith.addf %373, %374 : vector<2x32xf32>
    %376 = math.tanh %375 : vector<2x32xf32>
    %377 = arith.mulf %372, %376 : vector<2x32xf32>
    %378 = math.tanh %377 : vector<2x32xf32>
    %379 = arith.index_cast %c1_i32_153 : i32 to index
    %c0_160 = arith.constant 0 : index
    %c0_161 = arith.constant 0 : index
    %380 = vector.load %arg13[%379, %c0_160, %c0_161] : memref<8x2x32xf32, #tpu.memory_space<vmem>>, vector<1x2x32xf32>
    %381 = vector.shape_cast %380 : vector<1x2x32xf32> to vector<2x32xf32>
    %382 = vector.shape_cast %378 : vector<2x32xf32> to vector<1x2x32xf32>
    tpu.vector_store %arg13[%379, %c0_160, %c0_161], %382 {strides = array<i32>} : memref<8x2x32xf32, #tpu.memory_space<vmem>>, vector<1x2x32xf32>,
    %c2_i32_162 = arith.constant 2 : i32
    %383 = arith.index_cast %c2_i32_162 : i32 to index
    %c0_163 = arith.constant 0 : index
    %c0_164 = arith.constant 0 : index
    %384 = vector.load %arg12[%383, %c0_163, %c0_164] : memref<8x2x128xf32, #tpu.memory_space<vmem>>, vector<1x2x128xf32>
    %385 = vector.shape_cast %384 : vector<1x2x128xf32> to vector<2x128xf32>
    %c0_165 = arith.constant 0 : index
    %c0_166 = arith.constant 0 : index
    %386 = vector.load %arg5[%c0_165, %c0_166] : memref<32x128xf32, #tpu.memory_space<vmem>>, vector<32x128xf32>
    %cst_167 = arith.constant dense<0.000000e+00> : vector<2x128xf32>
    %387 = tpu.matmul %377, %386, %cst_167 {dimension_numbers = #tpu.dot_dimension_numbers<[1], [0], [0], [1], [0, 0, 1, 1], [], []>} : vector<2x32xf32>, vector<32x128xf32>, vector<2x128xf32> -> vector<2x128xf32>
    %388 = arith.addf %385, %387 : vector<2x128xf32>
    %389 = vector.extract_strided_slice %388 {offsets = [0, 0], sizes = [2, 96], strides = [1, 1]} : vector<2x128xf32> to vector<2x96xf32>
    %390 = arith.negf %389 : vector<2x96xf32>
    %391 = math.exp %390 : vector<2x96xf32>
    %cst_168 = arith.constant 1.000000e+00 : f32
    %392 = vector.broadcast %cst_168 : f32 to vector<2x96xf32>
    %393 = arith.addf %392, %391 : vector<2x96xf32>
    %394 = arith.divf %392, %393 : vector<2x96xf32>
    %395 = vector.extract_strided_slice %388 {offsets = [0, 96], sizes = [2, 32], strides = [1, 1]} : vector<2x128xf32> to vector<2x32xf32>
    %396 = math.tanh %395 : vector<2x32xf32>
    %397 = vector.extract_strided_slice %394 {offsets = [0, 0], sizes = [2, 32], strides = [1, 1]} : vector<2x96xf32> to vector<2x32xf32>
    %398 = vector.extract_strided_slice %394 {offsets = [0, 32], sizes = [2, 32], strides = [1, 1]} : vector<2x96xf32> to vector<2x32xf32>
    %399 = vector.extract_strided_slice %394 {offsets = [0, 64], sizes = [2, 32], strides = [1, 1]} : vector<2x96xf32> to vector<2x32xf32>
    %400 = arith.mulf %398, %375 : vector<2x32xf32>
    %401 = arith.mulf %397, %396 : vector<2x32xf32>
    %402 = arith.addf %400, %401 : vector<2x32xf32>
    %403 = math.tanh %402 : vector<2x32xf32>
    %404 = arith.mulf %399, %403 : vector<2x32xf32>
    %405 = math.tanh %404 : vector<2x32xf32>
    %406 = arith.index_cast %c2_i32_162 : i32 to index
    %c0_169 = arith.constant 0 : index
    %c0_170 = arith.constant 0 : index
    %407 = vector.load %arg13[%406, %c0_169, %c0_170] : memref<8x2x32xf32, #tpu.memory_space<vmem>>, vector<1x2x32xf32>
    %408 = vector.shape_cast %407 : vector<1x2x32xf32> to vector<2x32xf32>
    %409 = vector.shape_cast %405 : vector<2x32xf32> to vector<1x2x32xf32>
    tpu.vector_store %arg13[%406, %c0_169, %c0_170], %409 {strides = array<i32>} : memref<8x2x32xf32, #tpu.memory_space<vmem>>, vector<1x2x32xf32>,
    %c3_i32_171 = arith.constant 3 : i32
    %410 = arith.index_cast %c3_i32_171 : i32 to index
    %c0_172 = arith.constant 0 : index
    %c0_173 = arith.constant 0 : index
    %411 = vector.load %arg12[%410, %c0_172, %c0_173] : memref<8x2x128xf32, #tpu.memory_space<vmem>>, vector<1x2x128xf32>
    %412 = vector.shape_cast %411 : vector<1x2x128xf32> to vector<2x128xf32>
    %c0_174 = arith.constant 0 : index
    %c0_175 = arith.constant 0 : index
    %413 = vector.load %arg5[%c0_174, %c0_175] : memref<32x128xf32, #tpu.memory_space<vmem>>, vector<32x128xf32>
    %cst_176 = arith.constant dense<0.000000e+00> : vector<2x128xf32>
    %414 = tpu.matmul %404, %413, %cst_176 {dimension_numbers = #tpu.dot_dimension_numbers<[1], [0], [0], [1], [0, 0, 1, 1], [], []>} : vector<2x32xf32>, vector<32x128xf32>, vector<2x128xf32> -> vector<2x128xf32>
    %415 = arith.addf %412, %414 : vector<2x128xf32>
    %416 = vector.extract_strided_slice %415 {offsets = [0, 0], sizes = [2, 96], strides = [1, 1]} : vector<2x128xf32> to vector<2x96xf32>
    %417 = arith.negf %416 : vector<2x96xf32>
    %418 = math.exp %417 : vector<2x96xf32>
    %cst_177 = arith.constant 1.000000e+00 : f32
    %419 = vector.broadcast %cst_177 : f32 to vector<2x96xf32>
    %420 = arith.addf %419, %418 : vector<2x96xf32>
    %421 = arith.divf %419, %420 : vector<2x96xf32>
    %422 = vector.extract_strided_slice %415 {offsets = [0, 96], sizes = [2, 32], strides = [1, 1]} : vector<2x128xf32> to vector<2x32xf32>
    %423 = math.tanh %422 : vector<2x32xf32>
    %424 = vector.extract_strided_slice %421 {offsets = [0, 0], sizes = [2, 32], strides = [1, 1]} : vector<2x96xf32> to vector<2x32xf32>
    %425 = vector.extract_strided_slice %421 {offsets = [0, 32], sizes = [2, 32], strides = [1, 1]} : vector<2x96xf32> to vector<2x32xf32>
    %426 = vector.extract_strided_slice %421 {offsets = [0, 64], sizes = [2, 32], strides = [1, 1]} : vector<2x96xf32> to vector<2x32xf32>
    %427 = arith.mulf %425, %402 : vector<2x32xf32>
    %428 = arith.mulf %424, %423 : vector<2x32xf32>
    %429 = arith.addf %427, %428 : vector<2x32xf32>
    %430 = math.tanh %429 : vector<2x32xf32>
    %431 = arith.mulf %426, %430 : vector<2x32xf32>
    %432 = math.tanh %431 : vector<2x32xf32>
    %433 = arith.index_cast %c3_i32_171 : i32 to index
    %c0_178 = arith.constant 0 : index
    %c0_179 = arith.constant 0 : index
    %434 = vector.load %arg13[%433, %c0_178, %c0_179] : memref<8x2x32xf32, #tpu.memory_space<vmem>>, vector<1x2x32xf32>
    %435 = vector.shape_cast %434 : vector<1x2x32xf32> to vector<2x32xf32>
    %436 = vector.shape_cast %432 : vector<2x32xf32> to vector<1x2x32xf32>
    tpu.vector_store %arg13[%433, %c0_178, %c0_179], %436 {strides = array<i32>} : memref<8x2x32xf32, #tpu.memory_space<vmem>>, vector<1x2x32xf32>,
    %c4_i32_180 = arith.constant 4 : i32
    %437 = arith.index_cast %c4_i32_180 : i32 to index
    %c0_181 = arith.constant 0 : index
    %c0_182 = arith.constant 0 : index
    %438 = vector.load %arg12[%437, %c0_181, %c0_182] : memref<8x2x128xf32, #tpu.memory_space<vmem>>, vector<1x2x128xf32>
    %439 = vector.shape_cast %438 : vector<1x2x128xf32> to vector<2x128xf32>
    %c0_183 = arith.constant 0 : index
    %c0_184 = arith.constant 0 : index
    %440 = vector.load %arg5[%c0_183, %c0_184] : memref<32x128xf32, #tpu.memory_space<vmem>>, vector<32x128xf32>
    %cst_185 = arith.constant dense<0.000000e+00> : vector<2x128xf32>
    %441 = tpu.matmul %431, %440, %cst_185 {dimension_numbers = #tpu.dot_dimension_numbers<[1], [0], [0], [1], [0, 0, 1, 1], [], []>} : vector<2x32xf32>, vector<32x128xf32>, vector<2x128xf32> -> vector<2x128xf32>
    %442 = arith.addf %439, %441 : vector<2x128xf32>
    %443 = vector.extract_strided_slice %442 {offsets = [0, 0], sizes = [2, 96], strides = [1, 1]} : vector<2x128xf32> to vector<2x96xf32>
    %444 = arith.negf %443 : vector<2x96xf32>
    %445 = math.exp %444 : vector<2x96xf32>
    %cst_186 = arith.constant 1.000000e+00 : f32
    %446 = vector.broadcast %cst_186 : f32 to vector<2x96xf32>
    %447 = arith.addf %446, %445 : vector<2x96xf32>
    %448 = arith.divf %446, %447 : vector<2x96xf32>
    %449 = vector.extract_strided_slice %442 {offsets = [0, 96], sizes = [2, 32], strides = [1, 1]} : vector<2x128xf32> to vector<2x32xf32>
    %450 = math.tanh %449 : vector<2x32xf32>
    %451 = vector.extract_strided_slice %448 {offsets = [0, 0], sizes = [2, 32], strides = [1, 1]} : vector<2x96xf32> to vector<2x32xf32>
    %452 = vector.extract_strided_slice %448 {offsets = [0, 32], sizes = [2, 32], strides = [1, 1]} : vector<2x96xf32> to vector<2x32xf32>
    %453 = vector.extract_strided_slice %448 {offsets = [0, 64], sizes = [2, 32], strides = [1, 1]} : vector<2x96xf32> to vector<2x32xf32>
    %454 = arith.mulf %452, %429 : vector<2x32xf32>
    %455 = arith.mulf %451, %450 : vector<2x32xf32>
    %456 = arith.addf %454, %455 : vector<2x32xf32>
    %457 = math.tanh %456 : vector<2x32xf32>
    %458 = arith.mulf %453, %457 : vector<2x32xf32>
    %459 = math.tanh %458 : vector<2x32xf32>
    %460 = arith.index_cast %c4_i32_180 : i32 to index
    %c0_187 = arith.constant 0 : index
    %c0_188 = arith.constant 0 : index
    %461 = vector.load %arg13[%460, %c0_187, %c0_188] : memref<8x2x32xf32, #tpu.memory_space<vmem>>, vector<1x2x32xf32>
    %462 = vector.shape_cast %461 : vector<1x2x32xf32> to vector<2x32xf32>
    %463 = vector.shape_cast %459 : vector<2x32xf32> to vector<1x2x32xf32>
    tpu.vector_store %arg13[%460, %c0_187, %c0_188], %463 {strides = array<i32>} : memref<8x2x32xf32, #tpu.memory_space<vmem>>, vector<1x2x32xf32>,
    %c5_i32_189 = arith.constant 5 : i32
    %464 = arith.index_cast %c5_i32_189 : i32 to index
    %c0_190 = arith.constant 0 : index
    %c0_191 = arith.constant 0 : index
    %465 = vector.load %arg12[%464, %c0_190, %c0_191] : memref<8x2x128xf32, #tpu.memory_space<vmem>>, vector<1x2x128xf32>
    %466 = vector.shape_cast %465 : vector<1x2x128xf32> to vector<2x128xf32>
    %c0_192 = arith.constant 0 : index
    %c0_193 = arith.constant 0 : index
    %467 = vector.load %arg5[%c0_192, %c0_193] : memref<32x128xf32, #tpu.memory_space<vmem>>, vector<32x128xf32>
    %cst_194 = arith.constant dense<0.000000e+00> : vector<2x128xf32>
    %468 = tpu.matmul %458, %467, %cst_194 {dimension_numbers = #tpu.dot_dimension_numbers<[1], [0], [0], [1], [0, 0, 1, 1], [], []>} : vector<2x32xf32>, vector<32x128xf32>, vector<2x128xf32> -> vector<2x128xf32>
    %469 = arith.addf %466, %468 : vector<2x128xf32>
    %470 = vector.extract_strided_slice %469 {offsets = [0, 0], sizes = [2, 96], strides = [1, 1]} : vector<2x128xf32> to vector<2x96xf32>
    %471 = arith.negf %470 : vector<2x96xf32>
    %472 = math.exp %471 : vector<2x96xf32>
    %cst_195 = arith.constant 1.000000e+00 : f32
    %473 = vector.broadcast %cst_195 : f32 to vector<2x96xf32>
    %474 = arith.addf %473, %472 : vector<2x96xf32>
    %475 = arith.divf %473, %474 : vector<2x96xf32>
    %476 = vector.extract_strided_slice %469 {offsets = [0, 96], sizes = [2, 32], strides = [1, 1]} : vector<2x128xf32> to vector<2x32xf32>
    %477 = math.tanh %476 : vector<2x32xf32>
    %478 = vector.extract_strided_slice %475 {offsets = [0, 0], sizes = [2, 32], strides = [1, 1]} : vector<2x96xf32> to vector<2x32xf32>
    %479 = vector.extract_strided_slice %475 {offsets = [0, 32], sizes = [2, 32], strides = [1, 1]} : vector<2x96xf32> to vector<2x32xf32>
    %480 = vector.extract_strided_slice %475 {offsets = [0, 64], sizes = [2, 32], strides = [1, 1]} : vector<2x96xf32> to vector<2x32xf32>
    %481 = arith.mulf %479, %456 : vector<2x32xf32>
    %482 = arith.mulf %478, %477 : vector<2x32xf32>
    %483 = arith.addf %481, %482 : vector<2x32xf32>
    %484 = math.tanh %483 : vector<2x32xf32>
    %485 = arith.mulf %480, %484 : vector<2x32xf32>
    %486 = math.tanh %485 : vector<2x32xf32>
    %487 = arith.index_cast %c5_i32_189 : i32 to index
    %c0_196 = arith.constant 0 : index
    %c0_197 = arith.constant 0 : index
    %488 = vector.load %arg13[%487, %c0_196, %c0_197] : memref<8x2x32xf32, #tpu.memory_space<vmem>>, vector<1x2x32xf32>
    %489 = vector.shape_cast %488 : vector<1x2x32xf32> to vector<2x32xf32>
    %490 = vector.shape_cast %486 : vector<2x32xf32> to vector<1x2x32xf32>
    tpu.vector_store %arg13[%487, %c0_196, %c0_197], %490 {strides = array<i32>} : memref<8x2x32xf32, #tpu.memory_space<vmem>>, vector<1x2x32xf32>,
    %c6_i32_198 = arith.constant 6 : i32
    %491 = arith.index_cast %c6_i32_198 : i32 to index
    %c0_199 = arith.constant 0 : index
    %c0_200 = arith.constant 0 : index
    %492 = vector.load %arg12[%491, %c0_199, %c0_200] : memref<8x2x128xf32, #tpu.memory_space<vmem>>, vector<1x2x128xf32>
    %493 = vector.shape_cast %492 : vector<1x2x128xf32> to vector<2x128xf32>
    %c0_201 = arith.constant 0 : index
    %c0_202 = arith.constant 0 : index
    %494 = vector.load %arg5[%c0_201, %c0_202] : memref<32x128xf32, #tpu.memory_space<vmem>>, vector<32x128xf32>
    %cst_203 = arith.constant dense<0.000000e+00> : vector<2x128xf32>
    %495 = tpu.matmul %485, %494, %cst_203 {dimension_numbers = #tpu.dot_dimension_numbers<[1], [0], [0], [1], [0, 0, 1, 1], [], []>} : vector<2x32xf32>, vector<32x128xf32>, vector<2x128xf32> -> vector<2x128xf32>
    %496 = arith.addf %493, %495 : vector<2x128xf32>
    %497 = vector.extract_strided_slice %496 {offsets = [0, 0], sizes = [2, 96], strides = [1, 1]} : vector<2x128xf32> to vector<2x96xf32>
    %498 = arith.negf %497 : vector<2x96xf32>
    %499 = math.exp %498 : vector<2x96xf32>
    %cst_204 = arith.constant 1.000000e+00 : f32
    %500 = vector.broadcast %cst_204 : f32 to vector<2x96xf32>
    %501 = arith.addf %500, %499 : vector<2x96xf32>
    %502 = arith.divf %500, %501 : vector<2x96xf32>
    %503 = vector.extract_strided_slice %496 {offsets = [0, 96], sizes = [2, 32], strides = [1, 1]} : vector<2x128xf32> to vector<2x32xf32>
    %504 = math.tanh %503 : vector<2x32xf32>
    %505 = vector.extract_strided_slice %502 {offsets = [0, 0], sizes = [2, 32], strides = [1, 1]} : vector<2x96xf32> to vector<2x32xf32>
    %506 = vector.extract_strided_slice %502 {offsets = [0, 32], sizes = [2, 32], strides = [1, 1]} : vector<2x96xf32> to vector<2x32xf32>
    %507 = vector.extract_strided_slice %502 {offsets = [0, 64], sizes = [2, 32], strides = [1, 1]} : vector<2x96xf32> to vector<2x32xf32>
    %508 = arith.mulf %506, %483 : vector<2x32xf32>
    %509 = arith.mulf %505, %504 : vector<2x32xf32>
    %510 = arith.addf %508, %509 : vector<2x32xf32>
    %511 = math.tanh %510 : vector<2x32xf32>
    %512 = arith.mulf %507, %511 : vector<2x32xf32>
    %513 = math.tanh %512 : vector<2x32xf32>
    %514 = arith.index_cast %c6_i32_198 : i32 to index
    %c0_205 = arith.constant 0 : index
    %c0_206 = arith.constant 0 : index
    %515 = vector.load %arg13[%514, %c0_205, %c0_206] : memref<8x2x32xf32, #tpu.memory_space<vmem>>, vector<1x2x32xf32>
    %516 = vector.shape_cast %515 : vector<1x2x32xf32> to vector<2x32xf32>
    %517 = vector.shape_cast %513 : vector<2x32xf32> to vector<1x2x32xf32>
    tpu.vector_store %arg13[%514, %c0_205, %c0_206], %517 {strides = array<i32>} : memref<8x2x32xf32, #tpu.memory_space<vmem>>, vector<1x2x32xf32>,
    %c7_i32_207 = arith.constant 7 : i32
    %518 = arith.index_cast %c7_i32_207 : i32 to index
    %c0_208 = arith.constant 0 : index
    %c0_209 = arith.constant 0 : index
    %519 = vector.load %arg12[%518, %c0_208, %c0_209] : memref<8x2x128xf32, #tpu.memory_space<vmem>>, vector<1x2x128xf32>
    %520 = vector.shape_cast %519 : vector<1x2x128xf32> to vector<2x128xf32>
    %c0_210 = arith.constant 0 : index
    %c0_211 = arith.constant 0 : index
    %521 = vector.load %arg5[%c0_210, %c0_211] : memref<32x128xf32, #tpu.memory_space<vmem>>, vector<32x128xf32>
    %cst_212 = arith.constant dense<0.000000e+00> : vector<2x128xf32>
    %522 = tpu.matmul %512, %521, %cst_212 {dimension_numbers = #tpu.dot_dimension_numbers<[1], [0], [0], [1], [0, 0, 1, 1], [], []>} : vector<2x32xf32>, vector<32x128xf32>, vector<2x128xf32> -> vector<2x128xf32>
    %523 = arith.addf %520, %522 : vector<2x128xf32>
    %524 = vector.extract_strided_slice %523 {offsets = [0, 0], sizes = [2, 96], strides = [1, 1]} : vector<2x128xf32> to vector<2x96xf32>
    %525 = arith.negf %524 : vector<2x96xf32>
    %526 = math.exp %525 : vector<2x96xf32>
    %cst_213 = arith.constant 1.000000e+00 : f32
    %527 = vector.broadcast %cst_213 : f32 to vector<2x96xf32>
    %528 = arith.addf %527, %526 : vector<2x96xf32>
    %529 = arith.divf %527, %528 : vector<2x96xf32>
    %530 = vector.extract_strided_slice %523 {offsets = [0, 96], sizes = [2, 32], strides = [1, 1]} : vector<2x128xf32> to vector<2x32xf32>
    %531 = math.tanh %530 : vector<2x32xf32>
    %532 = vector.extract_strided_slice %529 {offsets = [0, 0], sizes = [2, 32], strides = [1, 1]} : vector<2x96xf32> to vector<2x32xf32>
    %533 = vector.extract_strided_slice %529 {offsets = [0, 32], sizes = [2, 32], strides = [1, 1]} : vector<2x96xf32> to vector<2x32xf32>
    %534 = vector.extract_strided_slice %529 {offsets = [0, 64], sizes = [2, 32], strides = [1, 1]} : vector<2x96xf32> to vector<2x32xf32>
    %535 = arith.mulf %533, %510 : vector<2x32xf32>
    %536 = arith.mulf %532, %531 : vector<2x32xf32>
    %537 = arith.addf %535, %536 : vector<2x32xf32>
    %538 = math.tanh %537 : vector<2x32xf32>
    %539 = arith.mulf %534, %538 : vector<2x32xf32>
    %540 = math.tanh %539 : vector<2x32xf32>
    %541 = arith.index_cast %c7_i32_207 : i32 to index
    %c0_214 = arith.constant 0 : index
    %c0_215 = arith.constant 0 : index
    %542 = vector.load %arg13[%541, %c0_214, %c0_215] : memref<8x2x32xf32, #tpu.memory_space<vmem>>, vector<1x2x32xf32>
    %543 = vector.shape_cast %542 : vector<1x2x32xf32> to vector<2x32xf32>
    %544 = vector.shape_cast %540 : vector<2x32xf32> to vector<1x2x32xf32>
    tpu.vector_store %arg13[%541, %c0_214, %c0_215], %544 {strides = array<i32>} : memref<8x2x32xf32, #tpu.memory_space<vmem>>, vector<1x2x32xf32>,
    %c8_i32_216 = arith.constant 8 : i32
    %c0_217 = arith.constant 0 : index
    %c0_218 = arith.constant 0 : index
    %c0_219 = arith.constant 0 : index
    %545 = vector.load %arg13[%c0_217, %c0_218, %c0_219] : memref<8x2x32xf32, #tpu.memory_space<vmem>>, vector<1x2x32xf32>
    %546 = vector.shape_cast %545 : vector<1x2x32xf32> to vector<2x32xf32>
    %c1_220 = arith.constant 1 : index
    %c0_221 = arith.constant 0 : index
    %c0_222 = arith.constant 0 : index
    %547 = vector.load %arg13[%c1_220, %c0_221, %c0_222] : memref<8x2x32xf32, #tpu.memory_space<vmem>>, vector<1x2x32xf32>
    %548 = vector.shape_cast %547 : vector<1x2x32xf32> to vector<2x32xf32>
    %c2_223 = arith.constant 2 : index
    %c0_224 = arith.constant 0 : index
    %c0_225 = arith.constant 0 : index
    %549 = vector.load %arg13[%c2_223, %c0_224, %c0_225] : memref<8x2x32xf32, #tpu.memory_space<vmem>>, vector<1x2x32xf32>
    %550 = vector.shape_cast %549 : vector<1x2x32xf32> to vector<2x32xf32>
    %c3_226 = arith.constant 3 : index
    %c0_227 = arith.constant 0 : index
    %c0_228 = arith.constant 0 : index
    %551 = vector.load %arg13[%c3_226, %c0_227, %c0_228] : memref<8x2x32xf32, #tpu.memory_space<vmem>>, vector<1x2x32xf32>
    %552 = vector.shape_cast %551 : vector<1x2x32xf32> to vector<2x32xf32>
    %c4_229 = arith.constant 4 : index
    %c0_230 = arith.constant 0 : index
    %c0_231 = arith.constant 0 : index
    %553 = vector.load %arg13[%c4_229, %c0_230, %c0_231] : memref<8x2x32xf32, #tpu.memory_space<vmem>>, vector<1x2x32xf32>
    %554 = vector.shape_cast %553 : vector<1x2x32xf32> to vector<2x32xf32>
    %c5_232 = arith.constant 5 : index
    %c0_233 = arith.constant 0 : index
    %c0_234 = arith.constant 0 : index
    %555 = vector.load %arg13[%c5_232, %c0_233, %c0_234] : memref<8x2x32xf32, #tpu.memory_space<vmem>>, vector<1x2x32xf32>
    %556 = vector.shape_cast %555 : vector<1x2x32xf32> to vector<2x32xf32>
    %c6_235 = arith.constant 6 : index
    %c0_236 = arith.constant 0 : index
    %c0_237 = arith.constant 0 : index
    %557 = vector.load %arg13[%c6_235, %c0_236, %c0_237] : memref<8x2x32xf32, #tpu.memory_space<vmem>>, vector<1x2x32xf32>
    %558 = vector.shape_cast %557 : vector<1x2x32xf32> to vector<2x32xf32>
    %c7_238 = arith.constant 7 : index
    %c0_239 = arith.constant 0 : index
    %c0_240 = arith.constant 0 : index
    %559 = vector.load %arg13[%c7_238, %c0_239, %c0_240] : memref<8x2x32xf32, #tpu.memory_space<vmem>>, vector<1x2x32xf32>
    %560 = vector.shape_cast %559 : vector<1x2x32xf32> to vector<2x32xf32>
    %561 = tpu.concatenate %546, %548, %550, %552, %554, %556, %558, %560 in 0 : vector<2x32xf32>, vector<2x32xf32>, vector<2x32xf32>, vector<2x32xf32>, vector<2x32xf32>, vector<2x32xf32>, vector<2x32xf32>, vector<2x32xf32> -> vector<16x32xf32>
    %c0_241 = arith.constant 0 : index
    %c0_242 = arith.constant 0 : index
    %562 = vector.load %arg7[%c0_241, %c0_242] : memref<32x32xf32, #tpu.memory_space<vmem>>, vector<32x32xf32>
    %cst_243 = arith.constant dense<0.000000e+00> : vector<16x32xf32>
    %563 = tpu.matmul %561, %562, %cst_243 {dimension_numbers = #tpu.dot_dimension_numbers<[1], [0], [0], [1], [0, 0, 1, 1], [], []>} : vector<16x32xf32>, vector<32x32xf32>, vector<16x32xf32> -> vector<16x32xf32>
    %c0_244 = arith.constant 0 : index
    %c0_245 = arith.constant 0 : index
    %564 = vector.load %arg8[%c0_244, %c0_245] : memref<1x32xf32, #tpu.memory_space<vmem>>, vector<1x32xf32>
    %565 = vector.broadcast %564 : vector<1x32xf32> to vector<16x32xf32>
    %566 = arith.addf %563, %565 : vector<16x32xf32>
    %cst_246 = arith.constant 0.000000e+00 : f32
    %567 = vector.broadcast %cst_246 : f32 to vector<16x32xf32>
    %568 = arith.maximumf %566, %567 : vector<16x32xf32>
    %c0_247 = arith.constant 0 : index
    %c0_248 = arith.constant 0 : index
    %569 = vector.load %arg9[%c0_247, %c0_248] : memref<1x32xf32, #tpu.memory_space<vmem>>, vector<1x32xf32>
    %570 = vector.broadcast %569 : vector<1x32xf32> to vector<16x32xf32>
    %571 = arith.mulf %568, %570 : vector<16x32xf32>
    %cst_249 = arith.constant dense<0.000000e+00> : vector<16xf32>
    %572 = vector.multi_reduction <add>, %571, %cst_249 [1] : vector<16x32xf32> to vector<16xf32>
    %573 = vector.shape_cast %572 : vector<16xf32> to vector<16x1xf32>
    %c0_250 = arith.constant 0 : index
    %c0_251 = arith.constant 0 : index
    %574 = vector.load %arg10[%c0_250, %c0_251] : memref<1x1xf32, #tpu.memory_space<vmem>>, vector<1x1xf32>
    %575 = vector.broadcast %574 : vector<1x1xf32> to vector<16x1xf32>
    %576 = arith.addf %573, %575 : vector<16x1xf32>
    %577 = arith.negf %576 : vector<16x1xf32>
    %578 = math.exp %577 : vector<16x1xf32>
    %cst_252 = arith.constant 1.000000e+00 : f32
    %579 = vector.broadcast %cst_252 : f32 to vector<16x1xf32>
    %580 = arith.addf %579, %578 : vector<16x1xf32>
    %581 = arith.divf %579, %580 : vector<16x1xf32>
    %582 = vector.extract_strided_slice %581 {offsets = [0, 0], sizes = [2, 1], strides = [1, 1]} : vector<16x1xf32> to vector<2x1xf32>
    %583 = vector.extract_strided_slice %581 {offsets = [2, 0], sizes = [2, 1], strides = [1, 1]} : vector<16x1xf32> to vector<2x1xf32>
    %584 = vector.extract_strided_slice %581 {offsets = [4, 0], sizes = [2, 1], strides = [1, 1]} : vector<16x1xf32> to vector<2x1xf32>
    %585 = vector.extract_strided_slice %581 {offsets = [6, 0], sizes = [2, 1], strides = [1, 1]} : vector<16x1xf32> to vector<2x1xf32>
    %586 = vector.extract_strided_slice %581 {offsets = [8, 0], sizes = [2, 1], strides = [1, 1]} : vector<16x1xf32> to vector<2x1xf32>
    %587 = vector.extract_strided_slice %581 {offsets = [10, 0], sizes = [2, 1], strides = [1, 1]} : vector<16x1xf32> to vector<2x1xf32>
    %588 = vector.extract_strided_slice %581 {offsets = [12, 0], sizes = [2, 1], strides = [1, 1]} : vector<16x1xf32> to vector<2x1xf32>
    %589 = vector.extract_strided_slice %581 {offsets = [14, 0], sizes = [2, 1], strides = [1, 1]} : vector<16x1xf32> to vector<2x1xf32>
    %590 = tpu.concatenate %582, %583, %584, %585, %586, %587, %588, %589 in 1 : vector<2x1xf32>, vector<2x1xf32>, vector<2x1xf32>, vector<2x1xf32>, vector<2x1xf32>, vector<2x1xf32>, vector<2x1xf32>, vector<2x1xf32> -> vector<2x8xf32>
    %c0_253 = arith.constant 0 : index
    %c0_254 = arith.constant 0 : index
    %591 = vector.load %arg11[%c0_253, %c0_254] : memref<2x8xf32, #tpu.memory_space<vmem>>, vector<2x8xf32>
    tpu.vector_store %arg11[%c0_253, %c0_254], %590 {strides = array<i32>} : memref<2x8xf32, #tpu.memory_space<vmem>>, vector<2x8xf32>,
    return
  }
}

</mosaic_0001>

<bundles_post_ra>
// kernel: lstm_linear_forward.1
= control target key start
LH: loop header
LB: loop body
LE: loop exit
PB: predicated region body
PF: predicated region fallthrough
CT: control target
= control target key end

     0   :  { %s3731_s0 = inlined_call_operand.hbm [shape: f32[2,8,16], index: 0, kind: input, shape index: {}]   ;;  %s3732_s1 = inlined_call_operand.hbm [shape: f32[16,128], index: 1, kind: input, shape index: {}]   ;;  %s3733_s2 = inlined_call_operand.hbm [shape: f32[32,128], index: 2, kind: input, shape index: {}]   ;;  %s3734_s3 = inlined_call_operand.vmem [shape: f32[1,128], index: 3, kind: input, shape index: {}]   ;;  %s3735_s4 = inlined_call_operand.hbm [shape: f32[32,128], index: 4, kind: input, shape index: {}]   ;;  %s3736_s5 = inlined_call_operand.hbm [shape: f32[32,128], index: 5, kind: input, shape index: {}]   ;;  %s3737_s6 = inlined_call_operand.vmem [shape: f32[1,128], index: 6, kind: input, shape index: {}]   ;;  %s3738_s7 = inlined_call_operand.hbm [shape: f32[32,32], index: 7, kind: input, shape index: {}]   ;;  %s3739_s8 = inlined_call_operand.vmem [shape: f32[1,32], index: 8, kind: input, shape index: {}]   ;;  %s3740_s9 = inlined_call_operand.vmem [shape: f32[1,32], index: 9, kind: input, shape index: {}]   ;;  %s3741_s10 = inlined_call_operand.<no memory space> [shape: f32[1,1], index: 10, kind: input, shape index: {}]   ;;  %s3742_s11 = inlined_call_operand.hbm [shape: f32[2,8], index: 11, kind: output, shape index: {}]  }
   0x1   :  { %v16_v0 = vstv %s3741_s10 }
   0x2   :  { %17 = vst [vmem:[#allocation4] sm:$0x1] %v16_v0 }
   0x3   :  { %18 = vsyncpa [#allocation6], 0 }
   0x4   :  { %19 = vsyncpa [#allocation9], 0 }
   0x5   :  { %20 = vsyncpa [#allocation12], 0 }
   0x6   :  { %21 = vsyncpa [#allocation15], 0 }
   0x7   :  { %22 = vsyncpa [#allocation7], 0  ;;  %s3224_s19 = smov [#allocation8]   ;;  %s3225_s21 = smov [#allocation11]  }
   0x8   :  { %s40_s20 = sshll.u32 %s3224_s19, 4  ;;  %s66_s22 = sshll.u32 %s3225_s21, 4  ;;  %s41_s20 = int_to_ptr.vmem [resolvable:$true] %s40_s20  ;;  %s3308_s22 = int_to_ptr.vmem [resolvable:$true] %s66_s22 }
   0x9   :  { %s3060_s25 = scalar_lea.hbm %s3732_s1, 256 }
   0xa   :  { %p3061_p0 = scmp.ne.s32.totalorder %s3732_s1, %s3060_s25  ;;  %p3064_p1 = scmp.lt.u32.totalorder %s3060_s25, %s3732_s1 }
   0xc   :  { %p3066_p2 = pnand %p3064_p1, %p3061_p0 }
   0xe   :  { %3069 = shalt.err (!%p3066_p2)
}
   0xf   :  { %s3070_s29 = scalar_lea.vmem %s41_s20, 256  ;;  %p3075_p4 = scmp.lt.s32.totalorder %s41_s20, %s41_s20 }
  0x10   :  { %p3071_p3 = scmp.ne.s32.totalorder %s41_s20, %s3070_s29  ;;  %p3076_p5 = scmp.lt.s32.totalorder %s3070_s29, %s3070_s29 }
  0x12   :  { %p3077_p6 = por %p3076_p5, %p3075_p4 }
  0x14   :  { %p3078_p7 = pnand %p3077_p6, %p3071_p3 }
  0x16   :  { %3081 = shalt.err (!%p3078_p7)
}
  0x17   :  { %s3226_s30 = smov 128   ;;  %s3227_s12 = smov 8  }
  0x18   :  { %46 = dma.hbm_to_vmem [thread:$0]  %s3732_s1, 256, %s41_s20, [#allocation9], %s3226_s30, %s3226_s30, %s3227_s12  }
  0x19   :  { %s3082_s17 = scalar_lea.hbm %s3735_s4, 512 }
  0x1a   :  { %p3083_p8 = scmp.ne.s32.totalorder %s3735_s4, %s3082_s17  ;;  %p3086_p9 = scmp.lt.u32.totalorder %s3082_s17, %s3735_s4 }
  0x1c   :  { %p3088_p10 = pnand %p3086_p9, %p3083_p8 }
  0x1e   :  { %3091 = shalt.err (!%p3088_p10)
}
  0x1f   :  { %s3092_s24 = scalar_lea.vmem %s3308_s22, 512  ;;  %p3097_p12 = scmp.lt.s32.totalorder %s3308_s22, %s3308_s22 }
  0x20   :  { %p3093_p11 = scmp.ne.s32.totalorder %s3308_s22, %s3092_s24  ;;  %p3098_p13 = scmp.lt.s32.totalorder %s3092_s24, %s3092_s24 }
  0x22   :  { %p3099_p0 = por %p3098_p13, %p3097_p12 }
  0x24   :  { %p3100_p1 = pnand %p3099_p0, %p3093_p11 }
  0x26   :  { %3103 = shalt.err (!%p3100_p1)
}
  0x27   :  { %72 = dma.hbm_to_vmem [thread:$0]  %s3735_s4, 512, %s3308_s22, [#allocation12], %s3226_s30, %s3226_s30, %s3227_s12  }
  0x28   :  { %s3228_s25 = smov [#allocation5]   ;;  %s3229_s27 = smov [#allocation10]  }
  0x29   :  { %s28_s26 = sshll.u32 %s3228_s25, 4  ;;  %s52_s10 = sshll.u32 %s3229_s27, 4  ;;  %s29_s26 = int_to_ptr.vmem [resolvable:$true] %s28_s26  ;;  %s3345_s10 = int_to_ptr.vmem [resolvable:$true] %s52_s10 }
  0x2a   :  { %s3104_s13 = scalar_lea.hbm %s3731_s0, 256 }
  0x2b   :  { %p3105_p2 = scmp.ne.s32.totalorder %s3731_s0, %s3104_s13  ;;  %p3108_p3 = scmp.lt.u32.totalorder %s3104_s13, %s3731_s0 }
  0x2d   :  { %p3110_p4 = pnand %p3108_p3, %p3105_p2 }
  0x2f   :  { %3113 = shalt.err (!%p3110_p4)
}
  0x30   :  { %s3114_s4 = scalar_lea.vmem %s29_s26, 256  ;;  %p3119_p6 = scmp.lt.s32.totalorder %s29_s26, %s29_s26 }
  0x31   :  { %p3115_p5 = scmp.ne.s32.totalorder %s29_s26, %s3114_s4  ;;  %p3120_p7 = scmp.lt.s32.totalorder %s3114_s4, %s3114_s4 }
  0x33   :  { %p3121_p8 = por %p3120_p7, %p3119_p6 }
  0x35   :  { %p3122_p9 = pnand %p3121_p8, %p3115_p5 }
  0x37   :  { %3125 = shalt.err (!%p3122_p9)
}
  0x38   :  { %34 = dma.hbm_to_vmem [thread:$0]  %s3731_s0, 256, %s29_s26, [#allocation6], %s3226_s30, %s3226_s30, %s3227_s12  }
  0x39   :  { %s3126_s23 = scalar_lea.hbm %s3733_s2, 512 }
  0x3a   :  { %p3127_p10 = scmp.ne.s32.totalorder %s3733_s2, %s3126_s23  ;;  %p3130_p11 = scmp.lt.u32.totalorder %s3126_s23, %s3733_s2 }
  0x3c   :  { %p3132_p12 = pnand %p3130_p11, %p3127_p10 }
  0x3e   :  { %3135 = shalt.err (!%p3132_p12)
}
  0x3f   :  { %s3136_s27 = scalar_lea.vmem %s3345_s10, 512  ;;  %p3141_p0 = scmp.lt.s32.totalorder %s3345_s10, %s3345_s10 }
  0x40   :  { %p3137_p13 = scmp.ne.s32.totalorder %s3345_s10, %s3136_s27  ;;  %p3142_p1 = scmp.lt.s32.totalorder %s3136_s27, %s3136_s27 }
  0x42   :  { %p3143_p2 = por %p3142_p1, %p3141_p0 }
  0x44   :  { %p3144_p3 = pnand %p3143_p2, %p3137_p13 }
  0x46   :  { %3147 = shalt.err (!%p3144_p3)
}
  0x47   :  { %58 = dma.hbm_to_vmem [thread:$0]  %s3733_s2, 512, %s3345_s10, [#allocation9], %s3226_s30, %s3226_s30, %s3227_s12  }
  0x48   :  { %s3230_s28 = smov [#allocation13]   ;;  %s3231_s13 = smov [#allocation14]  }
  0x49   :  { %s78_s29 = sshll.u32 %s3230_s28, 4  ;;  %s92_s14 = sshll.u32 %s3231_s13, 4  ;;  %s79_s29 = int_to_ptr.vmem [resolvable:$true] %s78_s29  ;;  %s3382_s14 = int_to_ptr.vmem [resolvable:$true] %s92_s14 }
  0x4a   :  { %s3148_s17 = scalar_lea.hbm %s3736_s5, 512 }
  0x4b   :  { %p3149_p4 = scmp.ne.s32.totalorder %s3736_s5, %s3148_s17  ;;  %p3152_p5 = scmp.lt.u32.totalorder %s3148_s17, %s3736_s5 }
  0x4d   :  { %p3154_p6 = pnand %p3152_p5, %p3149_p4 }
  0x4f   :  { %3157 = shalt.err (!%p3154_p6)
}
  0x50   :  { %s3158_s2 = scalar_lea.vmem %s79_s29, 512  ;;  %p3163_p8 = scmp.lt.s32.totalorder %s79_s29, %s79_s29 }
  0x51   :  { %p3159_p7 = scmp.ne.s32.totalorder %s79_s29, %s3158_s2  ;;  %p3164_p9 = scmp.lt.s32.totalorder %s3158_s2, %s3158_s2 }
  0x53   :  { %p3165_p10 = por %p3164_p9, %p3163_p8 }
  0x55   :  { %p3166_p11 = pnand %p3165_p10, %p3159_p7 }
  0x57   :  { %3169 = shalt.err (!%p3166_p11)
}
  0x58   :  { %84 = dma.hbm_to_vmem [thread:$0]  %s3736_s5, 512, %s79_s29, [#allocation12], %s3226_s30, %s3226_s30, %s3227_s12  }
  0x59   :  { %s3170_s1 = scalar_lea.hbm %s3738_s7, 512 }
  0x5a   :  { %p3171_p12 = scmp.ne.s32.totalorder %s3738_s7, %s3170_s1  ;;  %p3174_p13 = scmp.lt.u32.totalorder %s3170_s1, %s3738_s7 }
  0x5c   :  { %p3176_p0 = pnand %p3174_p13, %p3171_p12 }
  0x5e   :  { %3179 = shalt.err (!%p3176_p0)
}
  0x5f   :  { %s3180_s26 = scalar_lea.vmem %s3382_s14, 512  ;;  %p3185_p2 = scmp.lt.s32.totalorder %s3382_s14, %s3382_s14 }
  0x60   :  { %p3181_p1 = scmp.ne.s32.totalorder %s3382_s14, %s3180_s26  ;;  %p3186_p3 = scmp.lt.s32.totalorder %s3180_s26, %s3180_s26 }
  0x62   :  { %p3187_p4 = por %p3186_p3, %p3185_p2 }
  0x64   :  { %p3188_p5 = pnand %p3187_p4, %p3181_p1 }
  0x66   :  { %3191 = shalt.err (!%p3188_p5)
}
  0x67   :  { %98 = dma.hbm_to_vmem [thread:$0]  %s3738_s7, 512, %s3382_s14, [#allocation15], %s3226_s30, %s3226_s30, %s3227_s12  }
  0x68   :  { %3214 = dma.done.wait [#allocation6], 256  }
  0x69   :  { %3215 = vsyncadd [#allocation6], 4294967040 }
  0x6a   :  { %3216 = dma.done.wait [#allocation9], 768  }
  0x6b   :  { %3217 = vsyncadd [#allocation9], 4294966528 }
  0x6c   :  { %3218 = dma.done.wait [#allocation12], 1024  }
  0x6d   :  { %3219 = vsyncadd [#allocation12], 4294966272 }
  0x6e   :  { %3220 = dma.done.wait [#allocation15], 512  }
  0x6f   :  { %3221 = vsyncadd [#allocation15], 4294966784  ;;  %v3232_v1 = vmov 0.0|0.0   ;;  %vm3233_vm0 = vmmov 0   ;;  %v3234_v2 = vmov 0.0   ;;  %vm128_vm1 = vcmask 1041409  }
  0x70   :  { %2759 = vmatprep.subr.bf16.mxu1 %v3232_v1  ;;  %2565 = vmatprep.mubr.msk.f32.mxu1 %vm3233_vm0, %v3234_v2  ;;  %vm133_vm2 = vcmask 1043459   ;;  %vm138_vm3 = vcmask 1045509   ;;  %vm143_vm4 = vcmask 1047559   ;;  %vm161_vm5 = vcmask 1041408   ;;  %v170_v3 = vld [vmem:[#allocation8] sm:$0xff]  ;;  %v171_v4 = vld [vmem:[#allocation8 + $0x8] sm:$0xff] }
  0x71   :  { %v123_v5 = vld [vmem:[#allocation5] sm:$0xff]  ;;  %vm163_vm6 = vcmask 1043456   ;;  %vm165_vm7 = vcmask 1045504   ;;  %vm179_vm8 = vcmask 130048   ;;  %v2755_v6 = vpack.c.bf16 %v171_v4, %v170_v3  ;;  %v124_v7 = vld [vmem:[#allocation5 + $0x8] sm:$0xff]  ;;  %v279_v33 = vld [vmem:[#allocation10 + $0x10] sm:$0xff] }
  0x72   :  { %v131_v8 = vrot.slane %v123_v5, 7  ;;  %v136_v9 = vrot.slane %v123_v5, 6  ;;  %v141_v10 = vrot.slane %v123_v5, 5  ;;  %v127_v11 = vrot.slane %v124_v7, 7  ;;  %v277_v23 = vld [vmem:[#allocation10] sm:$0xff]  ;;  %v278_v24 = vld [vmem:[#allocation10 + $0x8] sm:$0xff] }
  0x73   :  { %v132_v12 = vrot.slane %v124_v7, 6  ;;  %v137_v13 = vrot.slane %v124_v7, 5  ;;  %v142_v14 = vrot.slane %v124_v7, 4  ;;  %2756 = vmatprep.subr.bf16.mxu0 %v2755_v6  ;;  %v146_v15 = vrot.slane %v123_v5, 4  ;;  %v280_v34 = vld [vmem:[#allocation10 + $0x18] sm:$0xff]  ;;  %s3235_s12 = smov 32  }
  0x74   :  { %v147_v16 = vrot.slane %v124_v7, 3  ;;  %v150_v17 = vrot.slane %v123_v5, 3  ;;  %v151_v18 = vrot.slane %v124_v7, 2  ;;  %2758 = vmatpush3.bf16.msra.mxu0 %v2755_v6  ;;  %v129_v19 = vsel %vm128_vm1, %v127_v11, %v123_v5  ;;  %v2411_v42 = vld [vmem:[%s3734_s3] ss:$0 sm:$0xff]  ;;  %s3236_s3 = smov 64  }
  0x75   :  { %v134_v20 = vsel %vm133_vm2, %v132_v12, %v131_v8  ;;  %v139_v21 = vsel %vm138_vm3, %v137_v13, %v136_v9  ;;  %v144_v22 = vsel %vm143_vm4, %v142_v14, %v141_v10  ;;  %v154_v28 = vrot.slane %v123_v5, 2  ;;  %2765 = vmatprep.subr.bf16.mxu0 %v3232_v1  ;;  %s3239_s17 = smov 2   ;;  %s3240_s4 = smov 1  }
  0x76   :  { %v162_v25 = vsel %vm161_vm5, %v129_v19, %v134_v20  ;;  %v148_v26 = vsel %vm128_vm1, %v147_v16, %v146_v15  ;;  %v152_v27 = vsel %vm133_vm2, %v151_v18, %v150_v17  ;;  %v155_v30 = vrot.slane %v124_v7, 1  ;;  %s3241_s22 = smov 6   ;;  %s3242_s18 = smov 3  }
  0x77   :  { %v164_v29 = vsel %vm163_vm6, %v162_v25, %v139_v21  ;;  %v158_v31 = vrot.slane %v123_v5, 1  ;;  %v167_v32 = vsel %vm161_vm5, %v148_v26, %v152_v27  ;;  %v3433_v36 = vpack.c.bf16 %v278_v24, %v277_v23  ;;  %s3243_s19 = smov 7   ;;  %s3244_s2 = smov [#allocation16]  }
  0x78   :  { %v166_v35 = vsel %vm165_vm7, %v164_v29, %v144_v22  ;;  %v156_v37 = vsel %vm138_vm3, %v155_v30, %v154_v28  ;;  %v3440_v40 = vpack.c.bf16 %v280_v34, %v279_v33  ;;  %vm281_vm9 = vcmask 261120   ;;  %s2399_s10 = sshll.u32 %s3244_s2, 4  ;;  %s2400_s10 = int_to_ptr.vmem [resolvable:$true] %s2399_s10 }
  0x79   :  { %2554 = vmatprep.mubr.msk.f32.mxu0 %vm179_vm8, %v166_v35  ;;  %v159_v38 = vsel %vm143_vm4, %v124_v7, %v158_v31  ;;  %v168_v39 = vsel %vm163_vm6, %v167_v32, %v156_v37  ;;  %2761 = vmatpush3.bf16.msra.mxu1 %v3433_v36  ;;  %vm385_vm10 = vcmask 254976   ;;  %vm2377_vm11 = vcmask 7168   ;;  %s3192_s21 = scalar_lea.vmem %s2400_s10, 32  ;;  %p3197_p7 = scmp.lt.s32.totalorder %s2400_s10, %s2400_s10 }
  0x7a   :  { %v169_v41 = vsel %vm165_vm7, %v168_v39, %v159_v38  ;;  %2762 = vmatprep.subr.bf16.mxu1 %v3232_v1  ;;  %vm2379_vm12 = vcmask 15360   ;;  %vm2381_vm13 = vcmask 23552   ;;  %vm2383_vm14 = vcmask 31744   ;;  %p3193_p6 = scmp.ne.s32.totalorder %s2400_s10, %s3192_s21  ;;  %p3198_p8 = scmp.lt.s32.totalorder %s3192_s21, %s3192_s21 }
  0x7b   :  { %2555 = vmatmul.mubr.msk.f32.vlgmr.msra.gmra.mrb[0].mxu0 %vm179_vm8, %v169_v41  ;;  %vm2385_vm15 = vcmask 39936   ;;  %vm2389_vm1 = vcmask 56320   ;;  %vm2391_vm2 = vcmask 58368  }
  0x7c   :  { %2767 = vmatpush3.bf16.msra.mxu0 %v3433_v36  ;;  %2576 = vmatprep.mubr.msk.f32.mxu0 %vm3233_vm0, %v3234_v2  ;;  %p3199_p9 = por %p3198_p8, %p3197_p7 }
  0x7d   :  { %2764 = vmatpush3.bf16.msra.mxu1 %v3440_v40  ;;  %2768 = vmatprep.subr.bf16.mxu0 %v3232_v1 }
  0x7e   :  { %2771 = vmatprep.subr.bf16.mxu1 %v3232_v1  ;;  %p3200_p10 = pnand %p3199_p9, %p3193_p6 }
  0x80   :  { %2566 = vmatmul.mubr.f32.vlgmr.msra.gmra.mrb[0].mxu1 %v3234_v2  ;;  %2770 = vmatpush3.bf16.msra.mxu0 %v3440_v40 }
  0x81   :  { %2773 = vmatpush3.bf16.msra.mxu1 %v3433_v36  ;;  %2587 = vmatprep.mubr.msk.f32.mxu1 %vm3233_vm0, %v3234_v2 }
  0x82   :  { %2774 = vmatprep.subr.bf16.mxu1 %v3232_v1  ;;  %2777 = vmatprep.subr.bf16.mxu0 %v3232_v1 }
  0x85   :  { %2776 = vmatpush3.bf16.msra.mxu1 %v3440_v40 }
  0x86   :  { %2783 = vmatprep.subr.bf16.mxu1 %v3232_v1 }
 0x14e   :  { %v2556_v43 = vpop.f32.mrb[0].mxu0 }
 0x14f   :  { %v258_v44 = vadd.f32 %v2556_v43, %v2411_v42  ;;  %v252_v45 = vpop.f32.mrb[1].mxu0 }
 0x150   :  { %v253_v46 = vadd.f32 %v2411_v42, %v252_v45 }
 0x151   :  { %269 = vst [vmem:[#allocation2 + $0x8] ss:$4 sps:$4 sm:$0xff] %v258_v44  }
 0x152   :  { %261 = vst [vmem:[#allocation2] ss:$4 sps:$4 sm:$0xff] %v253_v46  }
 0x153   :  { %v351_v47 = vpop.f32.mrb[0].mxu1 }
 0x154   :  { %v2567_v48 = vpop.f32.mrb[1].mxu1 }
 0x159   :  { %v276_v49 = vld [vmem:[#allocation2] sm:$0x3]  ;;  %v387_v3 = vld [vmem:[#allocation2 + $0x2] sm:$0x3]  ;;  %v499_v21 = vld [vmem:[#allocation2 + $0x4] sm:$0x3] }
 0x15a   :  { %v355_v50 = vadd.f32 %v351_v47, %v276_v49  ;;  %v611_v41 = vld [vmem:[#allocation2 + $0x6] sm:$0x3] }
 0x15c   :  { %2892 = vtanh.f32 %v355_v50  ;;  %v2414_v52 = vmul.f32 -1.442695, %v355_v50 }
 0x15e   :  { %2894 = vpow2.f32 %v2414_v52 }
 0x166   :  { %v2893_v51 = vpop.eup %2892 }
 0x167   :  { %365 = vrot.lane.b32.xlu0 %v2893_v51, %s3235_s12 }
 0x168   :  { %v2895_v53 = vpop.eup %2894 }
 0x169   :  { %v359_v54 = vadd.f32 1.0, %v2895_v53 }
 0x16b   :  { %2896 = vrcp.f32 %v359_v54 }
 0x175   :  { %v2897_v55 = vpop.eup %2896 }
 0x176   :  { %v363_v58 = vmul.f32 0.0, %v2897_v55 }
 0x1d9   :  { %v366_v56 = vpop.permute.xlu0 %365 }
 0x1da   :  { %v368_v57 = vmul.f32 %v2897_v55, %v366_v56 }
 0x1dc   :  { %370 = vrot.lane.b32.xlu0 %v368_v57, %s3235_s12 }
 0x24e   :  { %v371_v59 = vpop.permute.xlu0 %370 }
 0x24f   :  { %v373_v60 = vadd.f32 %v371_v59, %v363_v58  ;;  %v723_v59 = vld [vmem:[#allocation2 + $0x8] sm:$0x3] }
 0x251   :  { %2898 = vtanh.f32 %v373_v60 }
 0x25b   :  { %v2899_v61 = vpop.eup %2898 }
 0x25c   :  { %376 = vrot.lane.b32.xlu1 %v2899_v61, %s3235_s12 }
 0x2ce   :  { %v377_v62 = vpop.permute.xlu1 %376 }
 0x2cf   :  { %v3466_v63 = vmul.f32 %v2897_v55, %v377_v62 }
 0x2d1   :  { %393 = vrot.lane.b32.xlu1 %v3466_v63, %s3236_s3 }
 0x343   :  { %v394_v0 = vpop.permute.xlu1 %393 }
 0x344   :  { %2577 = vmatmul.mubr.msk.f32.vlgmr.msra.gmra.mrb[2].mxu0 %vm281_vm9, %v394_v0 }
 0x345   :  { %2779 = vmatpush3.bf16.msra.mxu0 %v3433_v36  ;;  %2598 = vmatprep.mubr.msk.f32.mxu0 %vm3233_vm0, %v3234_v2 }
 0x346   :  { %2780 = vmatprep.subr.bf16.mxu0 %v3232_v1 }
 0x349   :  { %2782 = vmatpush3.bf16.msra.mxu0 %v3440_v40 }
 0x34a   :  { %2789 = vmatprep.subr.bf16.mxu0 %v3232_v1 }
 0x417   :  { %v463_v4 = vpop.f32.mrb[2].mxu0 }
 0x418   :  { %v467_v5 = vadd.f32 %v463_v4, %v387_v3  ;;  %v2578_v6 = vpop.f32.mrb[3].mxu0 }
 0x41a   :  { %2900 = vtanh.f32 %v467_v5  ;;  %v2416_v8 = vmul.f32 -1.442695, %v467_v5 }
 0x41c   :  { %2902 = vpow2.f32 %v2416_v8 }
 0x424   :  { %v2901_v7 = vpop.eup %2900 }
 0x425   :  { %477 = vrot.lane.b32.xlu0 %v2901_v7, %s3235_s12 }
 0x426   :  { %v2903_v9 = vpop.eup %2902 }
 0x427   :  { %v471_v10 = vadd.f32 1.0, %v2903_v9 }
 0x429   :  { %2904 = vrcp.f32 %v471_v10 }
 0x433   :  { %v2905_v11 = vpop.eup %2904 }
 0x434   :  { %v475_v14 = vmul.f32 %v2905_v11, %v373_v60 }
 0x497   :  { %v478_v12 = vpop.permute.xlu0 %477 }
 0x498   :  { %v480_v13 = vmul.f32 %v2905_v11, %v478_v12 }
 0x49a   :  { %482 = vrot.lane.b32.xlu1 %v480_v13, %s3235_s12 }
 0x50c   :  { %v483_v15 = vpop.permute.xlu1 %482 }
 0x50d   :  { %v485_v16 = vadd.f32 %v483_v15, %v475_v14 }
 0x50f   :  { %2906 = vtanh.f32 %v485_v16 }
 0x519   :  { %v2907_v17 = vpop.eup %2906 }
 0x51a   :  { %488 = vrot.lane.b32.xlu0 %v2907_v17, %s3235_s12 }
 0x58c   :  { %v489_v18 = vpop.permute.xlu0 %488 }
 0x58d   :  { %v3480_v19 = vmul.f32 %v2905_v11, %v489_v18 }
 0x58f   :  { %505 = vrot.lane.b32.xlu1 %v3480_v19, %s3236_s3 }
 0x601   :  { %v506_v20 = vpop.permute.xlu1 %505 }
 0x602   :  { %2588 = vmatmul.mubr.msk.f32.vlgmr.msra.gmra.mrb[2].mxu1 %vm281_vm9, %v506_v20 }
 0x603   :  { %2785 = vmatpush3.bf16.msra.mxu1 %v3433_v36  ;;  %2609 = vmatprep.mubr.msk.f32.mxu1 %vm3233_vm0, %v3234_v2 }
 0x604   :  { %2786 = vmatprep.subr.bf16.mxu1 %v3232_v1 }
 0x607   :  { %2788 = vmatpush3.bf16.msra.mxu1 %v3440_v40 }
 0x608   :  { %2795 = vmatprep.subr.bf16.mxu1 %v3232_v1 }
 0x6d5   :  { %v575_v22 = vpop.f32.mrb[2].mxu1 }
 0x6d6   :  { %v579_v23 = vadd.f32 %v575_v22, %v499_v21  ;;  %v2589_v24 = vpop.f32.mrb[3].mxu1 }
 0x6d8   :  { %2908 = vtanh.f32 %v579_v23  ;;  %v2418_v26 = vmul.f32 -1.442695, %v579_v23 }
 0x6da   :  { %2910 = vpow2.f32 %v2418_v26 }
 0x6e2   :  { %v2909_v25 = vpop.eup %2908 }
 0x6e3   :  { %589 = vrot.lane.b32.xlu0 %v2909_v25, %s3235_s12 }
 0x6e4   :  { %v2911_v27 = vpop.eup %2910 }
 0x6e5   :  { %v583_v28 = vadd.f32 1.0, %v2911_v27 }
 0x6e7   :  { %2912 = vrcp.f32 %v583_v28 }
 0x6f1   :  { %v2913_v29 = vpop.eup %2912 }
 0x6f2   :  { %v587_v32 = vmul.f32 %v2913_v29, %v485_v16  ;;  %v835_v16 = vld [vmem:[#allocation2 + $0xa] sm:$0x3] }
 0x755   :  { %v590_v30 = vpop.permute.xlu0 %589 }
 0x756   :  { %v592_v31 = vmul.f32 %v2913_v29, %v590_v30 }
 0x758   :  { %594 = vrot.lane.b32.xlu1 %v592_v31, %s3235_s12 }
 0x7ca   :  { %v595_v33 = vpop.permute.xlu1 %594 }
 0x7cb   :  { %v597_v34 = vadd.f32 %v595_v33, %v587_v32  ;;  %v947_v33 = vld [vmem:[#allocation2 + $0xc] sm:$0x3] }
 0x7cd   :  { %2914 = vtanh.f32 %v597_v34 }
 0x7d7   :  { %v2915_v35 = vpop.eup %2914 }
 0x7d8   :  { %600 = vrot.lane.b32.xlu0 %v2915_v35, %s3235_s12 }
 0x84a   :  { %v601_v37 = vpop.permute.xlu0 %600 }
 0x84b   :  { %v3494_v38 = vmul.f32 %v2913_v29, %v601_v37 }
 0x84d   :  { %617 = vrot.lane.b32.xlu1 %v3494_v38, %s3236_s3 }
 0x8bf   :  { %v618_v39 = vpop.permute.xlu1 %617 }
 0x8c0   :  { %2599 = vmatmul.mubr.msk.f32.vlgmr.msra.gmra.mrb[4].mxu0 %vm281_vm9, %v618_v39 }
 0x8c1   :  { %2791 = vmatpush3.bf16.msra.mxu0 %v3433_v36  ;;  %2620 = vmatprep.mubr.msk.f32.mxu0 %vm3233_vm0, %v3234_v2 }
 0x8c2   :  { %2792 = vmatprep.subr.bf16.mxu0 %v3232_v1 }
 0x8c5   :  { %2794 = vmatpush3.bf16.msra.mxu0 %v3440_v40 }
 0x8c6   :  { %2801 = vmatprep.subr.bf16.mxu0 %v3232_v1 }
 0x993   :  { %v687_v42 = vpop.f32.mrb[4].mxu0 }
 0x994   :  { %v691_v43 = vadd.f32 %v687_v42, %v611_v41  ;;  %v2600_v44 = vpop.f32.mrb[5].mxu0 }
 0x996   :  { %2916 = vtanh.f32 %v691_v43  ;;  %v2420_v46 = vmul.f32 -1.442695, %v691_v43 }
 0x998   :  { %2918 = vpow2.f32 %v2420_v46 }
 0x9a0   :  { %v2917_v45 = vpop.eup %2916 }
 0x9a1   :  { %701 = vrot.lane.b32.xlu0 %v2917_v45, %s3235_s12 }
 0x9a2   :  { %v2919_v47 = vpop.eup %2918 }
 0x9a3   :  { %v695_v48 = vadd.f32 1.0, %v2919_v47 }
 0x9a5   :  { %2920 = vrcp.f32 %v695_v48 }
 0x9af   :  { %v2921_v49 = vpop.eup %2920 }
 0x9b0   :  { %v699_v52 = vmul.f32 %v2921_v49, %v597_v34 }
 0xa13   :  { %v702_v50 = vpop.permute.xlu0 %701 }
 0xa14   :  { %v704_v51 = vmul.f32 %v2921_v49, %v702_v50 }
 0xa16   :  { %706 = vrot.lane.b32.xlu1 %v704_v51, %s3235_s12 }
 0xa88   :  { %v707_v53 = vpop.permute.xlu1 %706 }
 0xa89   :  { %v709_v54 = vadd.f32 %v707_v53, %v699_v52 }
 0xa8b   :  { %2922 = vtanh.f32 %v709_v54 }
 0xa95   :  { %v2923_v55 = vpop.eup %2922 }
 0xa96   :  { %712 = vrot.lane.b32.xlu0 %v2923_v55, %s3235_s12 }
 0xb08   :  { %v713_v56 = vpop.permute.xlu0 %712 }
 0xb09   :  { %v3508_v57 = vmul.f32 %v2921_v49, %v713_v56 }
 0xb0b   :  { %729 = vrot.lane.b32.xlu1 %v3508_v57, %s3236_s3 }
 0xb7d   :  { %v730_v58 = vpop.permute.xlu1 %729 }
 0xb7e   :  { %2610 = vmatmul.mubr.msk.f32.vlgmr.msra.gmra.mrb[4].mxu1 %vm281_vm9, %v730_v58 }
 0xb7f   :  { %2797 = vmatpush3.bf16.msra.mxu1 %v3433_v36  ;;  %2631 = vmatprep.mubr.msk.f32.mxu1 %vm3233_vm0, %v3234_v2 }
 0xb80   :  { %2798 = vmatprep.subr.bf16.mxu1 %v3232_v1 }
 0xb83   :  { %2800 = vmatpush3.bf16.msra.mxu1 %v3440_v40 }
 0xc51   :  { %v799_v60 = vpop.f32.mrb[4].mxu1 }
 0xc52   :  { %v803_v61 = vadd.f32 %v799_v60, %v723_v59  ;;  %v2611_v62 = vpop.f32.mrb[5].mxu1 }
 0xc54   :  { %2924 = vtanh.f32 %v803_v61  ;;  %v2422_v3 = vmul.f32 -1.442695, %v803_v61 }
 0xc56   :  { %2926 = vpow2.f32 %v2422_v3 }
 0xc5e   :  { %v2925_v0 = vpop.eup %2924 }
 0xc5f   :  { %813 = vrot.lane.b32.xlu0 %v2925_v0, %s3235_s12 }
 0xc60   :  { %v2927_v4 = vpop.eup %2926 }
 0xc61   :  { %v807_v5 = vadd.f32 1.0, %v2927_v4 }
 0xc63   :  { %2928 = vrcp.f32 %v807_v5 }
 0xc6d   :  { %v2929_v6 = vpop.eup %2928 }
 0xc6e   :  { %v811_v9 = vmul.f32 %v2929_v6, %v709_v54  ;;  %v1059_v54 = vld [vmem:[#allocation2 + $0xe] sm:$0x3] }
 0xcd1   :  { %v814_v7 = vpop.permute.xlu0 %813 }
 0xcd2   :  { %v816_v8 = vmul.f32 %v2929_v6, %v814_v7 }
 0xcd4   :  { %818 = vrot.lane.b32.xlu1 %v816_v8, %s3235_s12 }
 0xd46   :  { %v819_v10 = vpop.permute.xlu1 %818 }
 0xd47   :  { %v821_v11 = vadd.f32 %v819_v10, %v811_v9 }
 0xd49   :  { %2930 = vtanh.f32 %v821_v11 }
 0xd53   :  { %v2931_v12 = vpop.eup %2930 }
 0xd54   :  { %824 = vrot.lane.b32.xlu0 %v2931_v12, %s3235_s12 }
 0xdc6   :  { %v825_v13 = vpop.permute.xlu0 %824 }
 0xdc7   :  { %v3521_v14 = vmul.f32 %v2929_v6, %v825_v13 }
 0xdc9   :  { %841 = vrot.lane.b32.xlu1 %v3521_v14, %s3236_s3 }
 0xe3b   :  { %v842_v15 = vpop.permute.xlu1 %841 }
 0xe3c   :  { %2621 = vmatmul.mubr.msk.f32.vlgmr.msra.gmra.mrb[6].mxu0 %vm281_vm9, %v842_v15 }
 0xe3d   :  { %2803 = vmatpush3.bf16.msra.mxu0 %v3433_v36  ;;  %2642 = vmatprep.mubr.msk.f32.mxu0 %vm3233_vm0, %v3234_v2 }
 0xe3e   :  { %2804 = vmatprep.subr.bf16.mxu0 %v3232_v1 }
 0xe41   :  { %2806 = vmatpush3.bf16.msra.mxu0 %v3440_v40 }
 0xe42   :  { %2815 = vmatprep.subr.bf16.mxu0 %v3232_v1 }
 0xf0f   :  { %v911_v17 = vpop.f32.mrb[6].mxu0 }
 0xf10   :  { %v915_v18 = vadd.f32 %v911_v17, %v835_v16  ;;  %v2622_v20 = vpop.f32.mrb[7].mxu0 }
 0xf11   :  { %v1204_v20 = vld [vmem:[#allocation11 + $0x8] sm:$0xff] }
 0xf12   :  { %2932 = vtanh.f32 %v915_v18  ;;  %v2424_v22 = vmul.f32 -1.442695, %v915_v18  ;;  %v1203_v18 = vld [vmem:[#allocation11] sm:$0xff] }
 0xf14   :  { %2934 = vpow2.f32 %v2424_v22  ;;  %v2807_v22 = vpack.c.bf16 %v1204_v20, %v1203_v18 }
 0xf16   :  { %2808 = vmatprep.subr.bf16.mxu1 %v2807_v22 }
 0xf1c   :  { %v2933_v21 = vpop.eup %2932 }
 0xf1d   :  { %925 = vrot.lane.b32.xlu0 %v2933_v21, %s3235_s12  ;;  %v1205_v21 = vld [vmem:[#allocation11 + $0x10] sm:$0xff] }
 0xf1e   :  { %v2935_v36 = vpop.eup %2934 }
 0xf1f   :  { %v919_v23 = vadd.f32 1.0, %v2935_v36  ;;  %v1206_v36 = vld [vmem:[#allocation11 + $0x18] sm:$0xff] }
 0xf21   :  { %2936 = vrcp.f32 %v919_v23  ;;  %v2811_v23 = vpack.c.bf16 %v1206_v36, %v1205_v21 }
 0xf2b   :  { %v2937_v24 = vpop.eup %2936 }
 0xf2c   :  { %v923_v40 = vmul.f32 %v2937_v24, %v821_v11 }
 0xf8f   :  { %v926_v25 = vpop.permute.xlu0 %925 }
 0xf90   :  { %v928_v26 = vmul.f32 %v2937_v24, %v926_v25 }
 0xf92   :  { %930 = vrot.lane.b32.xlu1 %v928_v26, %s3235_s12 }
0x1004   :  { %v931_v27 = vpop.permute.xlu1 %930 }
0x1005   :  { %v933_v28 = vadd.f32 %v931_v27, %v923_v40  ;;  %v1304_v27 = vld [vmem:[#allocation13] sm:$0xff] }
0x1007   :  { %2938 = vtanh.f32 %v933_v28 }
0x1011   :  { %v2939_v29 = vpop.eup %2938 }
0x1012   :  { %936 = vrot.lane.b32.xlu0 %v2939_v29, %s3235_s12 }
0x1084   :  { %v937_v30 = vpop.permute.xlu0 %936 }
0x1085   :  { %v939_v31 = vmul.f32 %v2937_v24, %v937_v30 }
0x1087   :  { %953 = vrot.lane.b32.xlu1 %v939_v31, %s3236_s3 }
0x10f9   :  { %v954_v32 = vpop.permute.xlu1 %953 }
0x10fa   :  { %2632 = vmatmul.mubr.msk.f32.vlgmr.msra.gmra.mrb[6].mxu1 %vm281_vm9, %v954_v32  ;;  %v1306_v32 = vld [vmem:[#allocation13 + $0x10] sm:$0xff] }
0x10fb   :  { %2810 = vmatpush3.bf16.msra.mxu1 %v2807_v22 }
0x10fc   :  { %2812 = vmatprep.subr.bf16.mxu1 %v2811_v23 }
0x10ff   :  { %2814 = vmatpush3.bf16.msra.mxu1 %v2811_v23 }
0x1100   :  { %2821 = vmatprep.subr.bf16.mxu1 %v3232_v1 }
0x11cd   :  { %v1023_v34 = vpop.f32.mrb[6].mxu1 }
0x11ce   :  { %v1027_v35 = vadd.f32 %v1023_v34, %v947_v33  ;;  %v2633_v37 = vpop.f32.mrb[7].mxu1  ;;  %v1307_v33 = vld [vmem:[#allocation13 + $0x18] sm:$0xff] }
0x11cf   :  { %v3571_v37 = vpack.c.bf16 %v1307_v33, %v1306_v32 }
0x11d0   :  { %2940 = vtanh.f32 %v1027_v35  ;;  %v2426_v41 = vmul.f32 -1.442695, %v1027_v35 }
0x11d2   :  { %2942 = vpow2.f32 %v2426_v41 }
0x11da   :  { %v2941_v39 = vpop.eup %2940 }
0x11db   :  { %1037 = vrot.lane.b32.xlu0 %v2941_v39, %s3235_s12 }
0x11dc   :  { %v2943_v42 = vpop.eup %2942 }
0x11dd   :  { %v1031_v43 = vadd.f32 1.0, %v2943_v42 }
0x11df   :  { %2944 = vrcp.f32 %v1031_v43 }
0x11e9   :  { %v2945_v44 = vpop.eup %2944 }
0x11ea   :  { %v1035_v47 = vmul.f32 %v2945_v44, %v933_v28  ;;  %v1305_v28 = vld [vmem:[#allocation13 + $0x8] sm:$0xff] }
0x124d   :  { %v1038_v45 = vpop.permute.xlu0 %1037 }
0x124e   :  { %v1040_v46 = vmul.f32 %v2945_v44, %v1038_v45 }
0x1250   :  { %1042 = vrot.lane.b32.xlu1 %v1040_v46, %s3235_s12 }
0x12c2   :  { %v1043_v48 = vpop.permute.xlu1 %1042 }
0x12c3   :  { %v1045_v49 = vadd.f32 %v1043_v48, %v1035_v47 }
0x12c5   :  { %2946 = vtanh.f32 %v1045_v49 }
0x12cf   :  { %v2947_v50 = vpop.eup %2946 }
0x12d0   :  { %1048 = vrot.lane.b32.xlu0 %v2947_v50, %s3235_s12 }
0x1342   :  { %v1049_v51 = vpop.permute.xlu0 %1048 }
0x1343   :  { %v1051_v52 = vmul.f32 %v2945_v44, %v1049_v51 }
0x1345   :  { %1065 = vrot.lane.b32.xlu1 %v1051_v52, %s3236_s3 }
0x13b7   :  { %v1066_v53 = vpop.permute.xlu1 %1065 }
0x13b8   :  { %2643 = vmatmul.mubr.msk.f32.vlgmr.msra.gmra.mrb[8].mxu0 %vm281_vm9, %v1066_v53 }
0x13b9   :  { %2664 = vmatprep.mubr.msk.f32.mxu0 %vm3233_vm0, %v3234_v2 }
0x148b   :  { %v1135_v55 = vpop.f32.mrb[8].mxu0 }
0x148c   :  { %v1139_v56 = vadd.f32 %v1135_v55, %v1059_v54  ;;  %v2644_v58 = vpop.f32.mrb[9].mxu0 }
0x148e   :  { %2948 = vtanh.f32 %v1139_v56  ;;  %v2428_v60 = vmul.f32 -1.442695, %v1139_v56 }
0x1490   :  { %2950 = vpow2.f32 %v2428_v60  ;;  %v2429_v60 = vld [vmem:[%s3737_s6] ss:$0 sm:$0xff] }
0x1498   :  { %v2949_v59 = vpop.eup %2948 }
0x1499   :  { %1149 = vrot.lane.b32.xlu0 %v2949_v59, %s3235_s12 }
0x149a   :  { %v2951_v61 = vpop.eup %2950 }
0x149b   :  { %v1143_v62 = vadd.f32 1.0, %v2951_v61 }
0x149d   :  { %2952 = vrcp.f32 %v1143_v62 }
0x149e   :  { %2954 = vtanh.f32 %v3480_v19 }
0x149f   :  { %2956 = vtanh.f32 %v939_v31  ;;  %v3567_v31 = vpack.c.bf16 %v1305_v28, %v1304_v27 }
0x14a0   :  { %2958 = vtanh.f32 %v3508_v57 }
0x14a1   :  { %2960 = vtanh.f32 %v3521_v14  ;;  %2817 = vmatpush3.bf16.msra.mxu0 %v3567_v31 }
0x14a2   :  { %2818 = vmatprep.subr.bf16.mxu0 %v3232_v1 }
0x14a5   :  { %2820 = vmatpush3.bf16.msra.mxu0 %v3571_v37 }
0x14a6   :  { %2827 = vmatprep.subr.bf16.mxu0 %v3232_v1 }
0x14a7   :  { %v2953_v0 = vpop.eup %2952 }
0x14a8   :  { %v2955_v5 = vpop.eup %2954  ;;  %v1147_v8 = vmul.f32 %v2953_v0, %v1045_v49  ;;  %2665 = vmatmul.mubr.f32.vlgmr.msra.gmra.mrb[10].mxu0 %v3234_v2 }
0x14a9   :  { %v2957_v6 = vpop.eup %2956  ;;  %2829 = vmatpush3.bf16.msra.mxu0 %v3567_v31  ;;  %2686 = vmatprep.mubr.msk.f32.mxu0 %vm3233_vm0, %v3234_v2 }
0x14aa   :  { %v2959_v7 = vpop.eup %2958  ;;  %2830 = vmatprep.subr.bf16.mxu0 %v3232_v1 }
0x14ab   :  { %v2961_v19 = vpop.eup %2960 }
0x14ad   :  { %2832 = vmatpush3.bf16.msra.mxu0 %v3571_v37 }
0x14ae   :  { %2839 = vmatprep.subr.bf16.mxu0 %v3232_v1 }
0x150b   :  { %v1150_v3 = vpop.permute.xlu0 %1149 }
0x150c   :  { %v1152_v4 = vmul.f32 %v2953_v0, %v1150_v3 }
0x150e   :  { %1154 = vrot.lane.b32.xlu1 %v1152_v4, %s3235_s12 }
0x1512   :  { %494 = vrot.lane.b32.xlu1 %v2955_v5, %s3236_s3 }
0x1516   :  { %942 = vrot.lane.b32.xlu1 %v2957_v6, %s3236_s3 }
0x151a   :  { %718 = vrot.lane.b32.xlu1 %v2959_v7, %s3236_s3 }
0x151e   :  { %830 = vrot.lane.b32.xlu1 %v2961_v19, %s3236_s3 }
0x157b   :  { %v1374_v58 = vpop.f32.mrb[10].mxu0 }
0x157c   :  { %v2666_v59 = vpop.f32.mrb[11].mxu0 }
0x1580   :  { %v1155_v9 = vpop.permute.xlu1 %1154 }
0x1581   :  { %v1157_v10 = vadd.f32 %v1155_v9, %v1147_v8 }
0x1583   :  { %2962 = vtanh.f32 %v1157_v10 }
0x1584   :  { %v495_v57 = vpop.permute.xlu1 %494  ;;  %2964 = vtanh.f32 %v3494_v38 }
0x1585   :  { %498 = vst.msk [vmem:[#allocation3 + $0x2] sm:$0x3] %vm385_vm10, %v495_v57  ;;  %2966 = vtanh.f32 %v3466_v63 }
0x1586   :  { %2968 = vtanh.f32 %v1051_v52 }
0x1588   :  { %v943_v11 = vpop.permute.xlu1 %942 }
0x1589   :  { %946 = vst.msk [vmem:[#allocation3 + $0xa] sm:$0x3] %vm385_vm10, %v943_v11 }
0x158c   :  { %v719_v12 = vpop.permute.xlu1 %718  ;;  %v1172_v40 = vld [vmem:[#allocation3 + $0x2] sm:$0x3] }
0x158d   :  { %v2963_v13 = vpop.eup %2962  ;;  %722 = vst.msk [vmem:[#allocation3 + $0x6] sm:$0x3] %vm385_vm10, %v719_v12  ;;  %v1180_v35 = vrot.slane %v1172_v40, 6 }
0x158e   :  { %1160 = vrot.lane.b32.xlu0 %v2963_v13, %s3235_s12  ;;  %v2965_v15 = vpop.eup %2964 }
0x158f   :  { %v2967_v16 = vpop.eup %2966 }
0x1590   :  { %v831_v14 = vpop.permute.xlu1 %830  ;;  %v2969_v38 = vpop.eup %2968  ;;  %v1176_v48 = vld [vmem:[#allocation3 + $0xa] sm:$0x3] }
0x1591   :  { %834 = vst.msk [vmem:[#allocation3 + $0x8] sm:$0x3] %vm385_vm10, %v831_v14  ;;  %v1189_v51 = vrot.slane %v1176_v48, 6 }
0x1592   :  { %606 = vrot.lane.b32.xlu0 %v2965_v15, %s3236_s3 }
0x1594   :  { %v1174_v34 = vld [vmem:[#allocation3 + $0x6] sm:$0x3] }
0x1595   :  { %v1186_v42 = vrot.slane %v1174_v34, 2 }
0x1596   :  { %382 = vrot.lane.b32.xlu0 %v2967_v16, %s3236_s3 }
0x1598   :  { %v1175_v49 = vld [vmem:[#allocation3 + $0x8] sm:$0x3] }
0x1599   :  { %v1200_v54 = vsel %vm161_vm5, %v1175_v49, %v1189_v51 }
0x159a   :  { %1054 = vrot.lane.b32.xlu0 %v2969_v38, %s3236_s3 }
0x1600   :  { %v1161_v63 = vpop.permute.xlu0 %1160 }
0x1601   :  { %v1163_v17 = vmul.f32 %v2953_v0, %v1161_v63 }
0x1603   :  { %2970 = vtanh.f32 %v1163_v17 }
0x1604   :  { %v607_v24 = vpop.permute.xlu0 %606 }
0x1605   :  { %610 = vst.msk [vmem:[#allocation3 + $0x4] sm:$0x3] %vm385_vm10, %v607_v24 }
0x1608   :  { %v383_v25 = vpop.permute.xlu0 %382 }
0x1609   :  { %386 = vst.msk [vmem:[#allocation3] sm:$0x3] %vm385_vm10, %v383_v25 }
0x160c   :  { %v1055_v26 = vpop.permute.xlu0 %1054  ;;  %v1173_v30 = vld [vmem:[#allocation3 + $0x4] sm:$0x3] }
0x160d   :  { %v2971_v29 = vpop.eup %2970  ;;  %1058 = vst.msk [vmem:[#allocation3 + $0xc] sm:$0x3] %vm385_vm10, %v1055_v26  ;;  %v1183_v41 = vrot.slane %v1173_v30, 4 }
0x160e   :  { %1166 = vrot.lane.b32.xlu0 %v2971_v29, %s3236_s3 }
0x1610   :  { %v1171_v39 = vld [vmem:[#allocation3] sm:$0x3] }
0x1611   :  { %v1197_v43 = vsel %vm161_vm5, %v1171_v39, %v1180_v35 }
0x1612   :  { %v1198_v44 = vsel %vm163_vm6, %v1197_v43, %v1183_v41 }
0x1613   :  { %v1199_v45 = vsel %vm165_vm7, %v1198_v44, %v1186_v42 }
0x1614   :  { %2653 = vmatprep.mubr.msk.f32.mxu1 %vm281_vm9, %v1199_v45  ;;  %v1177_v47 = vld [vmem:[#allocation3 + $0xc] sm:$0x3] }
0x1615   :  { %v1192_v50 = vrot.slane %v1177_v47, 4 }
0x1617   :  { %v1201_v55 = vsel %vm163_vm6, %v1200_v54, %v1192_v50 }
0x1680   :  { %v1167_v46 = vpop.permute.xlu0 %1166 }
0x1681   :  { %1170 = vst.msk [vmem:[#allocation3 + $0xe] sm:$0x3] %vm385_vm10, %v1167_v46 }
0x1688   :  { %v1178_v52 = vld [vmem:[#allocation3 + $0xe] sm:$0x3] }
0x1689   :  { %v1195_v53 = vrot.slane %v1178_v52, 2 }
0x168b   :  { %v1202_v56 = vsel %vm165_vm7, %v1201_v55, %v1195_v53 }
0x168c   :  { %2654 = vmatmul.mubr.msk.f32.vlgmr.msra.gmra.mrb[8].mxu1 %vm281_vm9, %v1202_v56 }
0x168d   :  { %2823 = vmatpush3.bf16.msra.mxu1 %v3567_v31  ;;  %2675 = vmatprep.mubr.msk.f32.mxu1 %vm3233_vm0, %v3234_v2 }
0x168e   :  { %2824 = vmatprep.subr.bf16.mxu1 %v3232_v1 }
0x1691   :  { %2826 = vmatpush3.bf16.msra.mxu1 %v3571_v37 }
0x1692   :  { %2833 = vmatprep.subr.bf16.mxu1 %v3232_v1 }
0x175f   :  { %v2655_v61 = vpop.f32.mrb[8].mxu1 }
0x1760   :  { %v1292_v62 = vadd.f32 %v2655_v61, %v2429_v60  ;;  %v1286_v0 = vpop.f32.mrb[9].mxu1 }
0x1761   :  { %v1287_v3 = vadd.f32 %v2429_v60, %v1286_v0 }
0x1762   :  { %1299 = vst [vmem:[#allocation2 + $0x8] ss:$4 sps:$4 sm:$0xff] %v1292_v62  }
0x1763   :  { %1295 = vst [vmem:[#allocation2] ss:$4 sps:$4 sm:$0xff] %v1287_v3  }
0x176a   :  { %v1303_v4 = vld [vmem:[#allocation2] sm:$0x3]  ;;  %v1409_v63 = vld [vmem:[#allocation2 + $0x2] sm:$0x3]  ;;  %v1520_v34 = vld [vmem:[#allocation2 + $0x4] sm:$0x3] }
0x176b   :  { %v1378_v5 = vadd.f32 %v1374_v58, %v1303_v4  ;;  %v1631_v56 = vld [vmem:[#allocation2 + $0x6] sm:$0x3] }
0x176d   :  { %2972 = vtanh.f32 %v1378_v5  ;;  %v2432_v7 = vmul.f32 -1.442695, %v1378_v5 }
0x176f   :  { %2974 = vpow2.f32 %v2432_v7 }
0x1777   :  { %v2973_v6 = vpop.eup %2972 }
0x1778   :  { %1388 = vrot.lane.b32.xlu1 %v2973_v6, %s3235_s12 }
0x1779   :  { %v2975_v19 = vpop.eup %2974 }
0x177a   :  { %v1382_v8 = vadd.f32 1.0, %v2975_v19 }
0x177c   :  { %2976 = vrcp.f32 %v1382_v8 }
0x1786   :  { %v2977_v9 = vpop.eup %2976 }
0x1787   :  { %v1386_v11 = vmul.f32 0.0, %v2977_v9 }
0x17ea   :  { %v1389_v10 = vpop.permute.xlu1 %1388 }
0x17eb   :  { %v1391_v57 = vmul.f32 %v2977_v9, %v1389_v10 }
0x17ed   :  { %1393 = vrot.lane.b32.xlu0 %v1391_v57, %s3235_s12 }
0x185f   :  { %v1394_v12 = vpop.permute.xlu0 %1393 }
0x1860   :  { %v1396_v13 = vadd.f32 %v1394_v12, %v1386_v11  ;;  %v1742_v12 = vld [vmem:[#allocation2 + $0x8] sm:$0x3] }
0x1862   :  { %2978 = vtanh.f32 %v1396_v13 }
0x186c   :  { %v2979_v14 = vpop.eup %2978 }
0x186d   :  { %1399 = vrot.lane.b32.xlu1 %v2979_v14, %s3235_s12 }
0x18df   :  { %v1400_v15 = vpop.permute.xlu1 %1399 }
0x18e0   :  { %v3604_v16 = vmul.f32 %v2977_v9, %v1400_v15 }
0x18e2   :  { %1415 = vrot.lane.b32.xlu0 %v3604_v16, %s3236_s3 }
0x1954   :  { %v1416_v38 = vpop.permute.xlu0 %1415 }
0x1955   :  { %2676 = vmatmul.mubr.msk.f32.vlgmr.msra.gmra.mrb[10].mxu1 %vm281_vm9, %v1416_v38 }
0x1956   :  { %2835 = vmatpush3.bf16.msra.mxu1 %v3567_v31  ;;  %2697 = vmatprep.mubr.msk.f32.mxu1 %vm3233_vm0, %v3234_v2 }
0x1957   :  { %2836 = vmatprep.subr.bf16.mxu1 %v3232_v1 }
0x195a   :  { %2838 = vmatpush3.bf16.msra.mxu1 %v3571_v37 }
0x195b   :  { %2845 = vmatprep.subr.bf16.mxu1 %v3232_v1 }
0x1a28   :  { %v1485_v17 = vpop.f32.mrb[10].mxu1 }
0x1a29   :  { %v1489_v18 = vadd.f32 %v1485_v17, %v1409_v63  ;;  %v2677_v20 = vpop.f32.mrb[11].mxu1 }
0x1a2b   :  { %2980 = vtanh.f32 %v1489_v18  ;;  %v2434_v22 = vmul.f32 -1.442695, %v1489_v18 }
0x1a2d   :  { %2982 = vpow2.f32 %v2434_v22 }
0x1a35   :  { %v2981_v21 = vpop.eup %2980 }
0x1a36   :  { %1499 = vrot.lane.b32.xlu1 %v2981_v21, %s3235_s12 }
0x1a37   :  { %v2983_v36 = vpop.eup %2982 }
0x1a38   :  { %v1493_v23 = vadd.f32 1.0, %v2983_v36 }
0x1a3a   :  { %2984 = vrcp.f32 %v1493_v23 }
0x1a44   :  { %v2985_v24 = vpop.eup %2984 }
0x1a45   :  { %v1497_v40 = vmul.f32 %v2985_v24, %v1396_v13 }
0x1aa8   :  { %v1500_v25 = vpop.permute.xlu1 %1499 }
0x1aa9   :  { %v1502_v26 = vmul.f32 %v2985_v24, %v1500_v25 }
0x1aab   :  { %1504 = vrot.lane.b32.xlu0 %v1502_v26, %s3235_s12 }
0x1b1d   :  { %v1505_v27 = vpop.permute.xlu0 %1504 }
0x1b1e   :  { %v1507_v28 = vadd.f32 %v1505_v27, %v1497_v40 }
0x1b20   :  { %2986 = vtanh.f32 %v1507_v28 }
0x1b2a   :  { %v2987_v29 = vpop.eup %2986 }
0x1b2b   :  { %1510 = vrot.lane.b32.xlu1 %v2987_v29, %s3235_s12 }
0x1b9d   :  { %v1511_v30 = vpop.permute.xlu1 %1510 }
0x1b9e   :  { %v3618_v32 = vmul.f32 %v2985_v24, %v1511_v30 }
0x1ba0   :  { %1526 = vrot.lane.b32.xlu0 %v3618_v32, %s3236_s3 }
0x1c12   :  { %v1527_v33 = vpop.permute.xlu0 %1526 }
0x1c13   :  { %2687 = vmatmul.mubr.msk.f32.vlgmr.msra.gmra.mrb[12].mxu0 %vm281_vm9, %v1527_v33 }
0x1c14   :  { %2841 = vmatpush3.bf16.msra.mxu0 %v3567_v31  ;;  %2708 = vmatprep.mubr.msk.f32.mxu0 %vm3233_vm0, %v3234_v2 }
0x1c15   :  { %2842 = vmatprep.subr.bf16.mxu0 %v3232_v1 }
0x1c18   :  { %2844 = vmatpush3.bf16.msra.mxu0 %v3571_v37 }
0x1c19   :  { %2851 = vmatprep.subr.bf16.mxu0 %v3232_v1 }
0x1ce6   :  { %v1596_v35 = vpop.f32.mrb[12].mxu0 }
0x1ce7   :  { %v1600_v39 = vadd.f32 %v1596_v35, %v1520_v34  ;;  %v2688_v41 = vpop.f32.mrb[13].mxu0 }
0x1ce9   :  { %2988 = vtanh.f32 %v1600_v39  ;;  %v2436_v43 = vmul.f32 -1.442695, %v1600_v39 }
0x1ceb   :  { %2990 = vpow2.f32 %v2436_v43 }
0x1cf3   :  { %v2989_v42 = vpop.eup %2988 }
0x1cf4   :  { %1610 = vrot.lane.b32.xlu1 %v2989_v42, %s3235_s12 }
0x1cf5   :  { %v2991_v44 = vpop.eup %2990 }
0x1cf6   :  { %v1604_v45 = vadd.f32 1.0, %v2991_v44 }
0x1cf8   :  { %2992 = vrcp.f32 %v1604_v45 }
0x1d02   :  { %v2993_v46 = vpop.eup %2992 }
0x1d03   :  { %v1608_v49 = vmul.f32 %v2993_v46, %v1507_v28  ;;  %v1853_v28 = vld [vmem:[#allocation2 + $0xa] sm:$0x3] }
0x1d66   :  { %v1611_v47 = vpop.permute.xlu1 %1610 }
0x1d67   :  { %v1613_v48 = vmul.f32 %v2993_v46, %v1611_v47 }
0x1d69   :  { %1615 = vrot.lane.b32.xlu0 %v1613_v48, %s3235_s12  ;;  %v1964_v48 = vld [vmem:[#allocation2 + $0xc] sm:$0x3] }
0x1ddb   :  { %v1616_v50 = vpop.permute.xlu0 %1615 }
0x1ddc   :  { %v1618_v51 = vadd.f32 %v1616_v50, %v1608_v49 }
0x1dde   :  { %2994 = vtanh.f32 %v1618_v51 }
0x1de8   :  { %v2995_v52 = vpop.eup %2994 }
0x1de9   :  { %1621 = vrot.lane.b32.xlu1 %v2995_v52, %s3235_s12 }
0x1e5b   :  { %v1622_v53 = vpop.permute.xlu1 %1621 }
0x1e5c   :  { %v3632_v54 = vmul.f32 %v2993_v46, %v1622_v53 }
0x1e5e   :  { %1637 = vrot.lane.b32.xlu0 %v3632_v54, %s3236_s3 }
0x1ed0   :  { %v1638_v55 = vpop.permute.xlu0 %1637 }
0x1ed1   :  { %2698 = vmatmul.mubr.msk.f32.vlgmr.msra.gmra.mrb[12].mxu1 %vm281_vm9, %v1638_v55 }
0x1ed2   :  { %2847 = vmatpush3.bf16.msra.mxu1 %v3567_v31  ;;  %2719 = vmatprep.mubr.msk.f32.mxu1 %vm3233_vm0, %v3234_v2 }
0x1ed3   :  { %2848 = vmatprep.subr.bf16.mxu1 %v3232_v1 }
0x1ed6   :  { %2850 = vmatpush3.bf16.msra.mxu1 %v3571_v37 }
0x1ed7   :  { %2857 = vmatprep.subr.bf16.mxu1 %v3232_v1 }
0x1fa4   :  { %v1707_v58 = vpop.f32.mrb[12].mxu1 }
0x1fa5   :  { %v1711_v59 = vadd.f32 %v1707_v58, %v1631_v56  ;;  %v2699_v60 = vpop.f32.mrb[13].mxu1 }
0x1fa7   :  { %2996 = vtanh.f32 %v1711_v59  ;;  %v2438_v62 = vmul.f32 -1.442695, %v1711_v59 }
0x1fa9   :  { %2998 = vpow2.f32 %v2438_v62 }
0x1fb1   :  { %v2997_v61 = vpop.eup %2996 }
0x1fb2   :  { %1721 = vrot.lane.b32.xlu1 %v2997_v61, %s3235_s12 }
0x1fb3   :  { %v2999_v0 = vpop.eup %2998 }
0x1fb4   :  { %v1715_v3 = vadd.f32 1.0, %v2999_v0 }
0x1fb6   :  { %3000 = vrcp.f32 %v1715_v3 }
0x1fc0   :  { %v3001_v4 = vpop.eup %3000 }
0x1fc1   :  { %v1719_v7 = vmul.f32 %v3001_v4, %v1618_v51 }
0x2024   :  { %v1722_v5 = vpop.permute.xlu1 %1721 }
0x2025   :  { %v1724_v6 = vmul.f32 %v3001_v4, %v1722_v5 }
0x2027   :  { %1726 = vrot.lane.b32.xlu0 %v1724_v6, %s3235_s12 }
0x2099   :  { %v1727_v19 = vpop.permute.xlu0 %1726 }
0x209a   :  { %v1729_v8 = vadd.f32 %v1727_v19, %v1719_v7  ;;  %v2075_v7 = vld [vmem:[#allocation2 + $0xe] sm:$0x3] }
0x209c   :  { %3002 = vtanh.f32 %v1729_v8 }
0x20a6   :  { %v3003_v9 = vpop.eup %3002 }
0x20a7   :  { %1732 = vrot.lane.b32.xlu1 %v3003_v9, %s3235_s12 }
0x2119   :  { %v1733_v10 = vpop.permute.xlu1 %1732 }
0x211a   :  { %v3646_v57 = vmul.f32 %v3001_v4, %v1733_v10 }
0x211c   :  { %1748 = vrot.lane.b32.xlu0 %v3646_v57, %s3236_s3 }
0x218e   :  { %v1749_v11 = vpop.permute.xlu0 %1748 }
0x218f   :  { %2709 = vmatmul.mubr.msk.f32.vlgmr.msra.gmra.mrb[14].mxu0 %vm281_vm9, %v1749_v11 }
0x2190   :  { %2853 = vmatpush3.bf16.msra.mxu0 %v3567_v31  ;;  %2730 = vmatprep.mubr.msk.f32.mxu0 %vm3233_vm0, %v3234_v2 }
0x2191   :  { %2854 = vmatprep.subr.bf16.mxu0 %v3232_v1 }
0x2194   :  { %2856 = vmatpush3.bf16.msra.mxu0 %v3571_v37 }
0x2262   :  { %v1818_v13 = vpop.f32.mrb[14].mxu0 }
0x2263   :  { %v1822_v14 = vadd.f32 %v1818_v13, %v1742_v12  ;;  %v2710_v15 = vpop.f32.mrb[15].mxu0 }
0x2265   :  { %3004 = vtanh.f32 %v1822_v14  ;;  %v2440_v63 = vmul.f32 -1.442695, %v1822_v14 }
0x2267   :  { %3006 = vpow2.f32 %v2440_v63 }
0x226f   :  { %v3005_v38 = vpop.eup %3004 }
0x2270   :  { %1832 = vrot.lane.b32.xlu1 %v3005_v38, %s3235_s12 }
0x2271   :  { %v3007_v17 = vpop.eup %3006 }
0x2272   :  { %v1826_v18 = vadd.f32 1.0, %v3007_v17 }
0x2274   :  { %3008 = vrcp.f32 %v1826_v18 }
0x227e   :  { %v3009_v20 = vpop.eup %3008 }
0x227f   :  { %v1830_v36 = vmul.f32 %v3009_v20, %v1729_v8 }
0x22e2   :  { %v1833_v21 = vpop.permute.xlu1 %1832 }
0x22e3   :  { %v1835_v22 = vmul.f32 %v3009_v20, %v1833_v21 }
0x22e5   :  { %1837 = vrot.lane.b32.xlu0 %v1835_v22, %s3235_s12 }
0x2357   :  { %v1838_v23 = vpop.permute.xlu0 %1837 }
0x2358   :  { %v1840_v24 = vadd.f32 %v1838_v23, %v1830_v36 }
0x235a   :  { %3010 = vtanh.f32 %v1840_v24 }
0x2364   :  { %v3011_v25 = vpop.eup %3010 }
0x2365   :  { %1843 = vrot.lane.b32.xlu1 %v3011_v25, %s3235_s12 }
0x23d7   :  { %v1844_v26 = vpop.permute.xlu1 %1843 }
0x23d8   :  { %v3659_v40 = vmul.f32 %v3009_v20, %v1844_v26 }
0x23da   :  { %1859 = vrot.lane.b32.xlu0 %v3659_v40, %s3236_s3 }
0x244c   :  { %v1860_v27 = vpop.permute.xlu0 %1859 }
0x244d   :  { %2720 = vmatmul.mubr.msk.f32.vlgmr.msra.gmra.mrb[14].mxu1 %vm281_vm9, %v1860_v27 }
0x244e   :  { %2859 = vmatpush3.bf16.msra.mxu1 %v3567_v31  ;;  %2741 = vmatprep.mubr.msk.f32.mxu1 %vm3233_vm0, %v3234_v2  ;;  %vm2387_vm0 = vcmask 48128  }
0x244f   :  { %2860 = vmatprep.subr.bf16.mxu1 %v3232_v1 }
0x2452   :  { %2862 = vmatpush3.bf16.msra.mxu1 %v3571_v37 }
0x2520   :  { %v1929_v29 = vpop.f32.mrb[14].mxu1 }
0x2521   :  { %v1933_v30 = vadd.f32 %v1929_v29, %v1853_v28  ;;  %v2721_v33 = vpop.f32.mrb[15].mxu1  ;;  %v2218_v28 = vld [vmem:[#allocation14] sm:$0xff]  ;;  %v2219_v29 = vld [vmem:[#allocation14 + $0x8] sm:$0xff] }
0x2522   :  { %v2863_v33 = vpack.c.bf16 %v2219_v29, %v2218_v28 }
0x2523   :  { %3012 = vtanh.f32 %v1933_v30  ;;  %v2442_v35 = vmul.f32 -1.442695, %v1933_v30  ;;  %v2220_v30 = vld [vmem:[#allocation14 + $0x10] sm:$0xff] }
0x2524   :  { %2864 = vmatprep.subr.bf16.mxu0 %v2863_v33 }
0x2525   :  { %3014 = vpow2.f32 %v2442_v35 }
0x252d   :  { %v3013_v34 = vpop.eup %3012 }
0x252e   :  { %1943 = vrot.lane.b32.xlu1 %v3013_v34, %s3235_s12  ;;  %v2221_v34 = vld [vmem:[#allocation14 + $0x18] sm:$0xff] }
0x252f   :  { %v3015_v39 = vpop.eup %3014  ;;  %v2867_v35 = vpack.c.bf16 %v2221_v34, %v2220_v30 }
0x2530   :  { %v1937_v41 = vadd.f32 1.0, %v3015_v39 }
0x2532   :  { %3016 = vrcp.f32 %v1937_v41 }
0x253c   :  { %v3017_v31 = vpop.eup %3016 }
0x253d   :  { %v1941_v1 = vmul.f32 %v3017_v31, %v1840_v24 }
0x25a0   :  { %v1944_v42 = vpop.permute.xlu1 %1943 }
0x25a1   :  { %v1946_v2 = vmul.f32 %v3017_v31, %v1944_v42 }
0x25a3   :  { %1948 = vrot.lane.b32.xlu0 %v1946_v2, %s3235_s12 }
0x2615   :  { %v1949_v37 = vpop.permute.xlu0 %1948 }
0x2616   :  { %v1951_v43 = vadd.f32 %v1949_v37, %v1941_v1 }
0x2618   :  { %3018 = vtanh.f32 %v1951_v43 }
0x2622   :  { %v3019_v44 = vpop.eup %3018 }
0x2623   :  { %1954 = vrot.lane.b32.xlu1 %v3019_v44, %s3235_s12 }
0x2695   :  { %v1955_v45 = vpop.permute.xlu1 %1954 }
0x2696   :  { %v1957_v46 = vmul.f32 %v3017_v31, %v1955_v45 }
0x2698   :  { %1970 = vrot.lane.b32.xlu0 %v1957_v46, %s3236_s3 }
0x270a   :  { %v1971_v47 = vpop.permute.xlu0 %1970 }
0x270b   :  { %2731 = vmatmul.mubr.msk.f32.vlgmr.msra.gmra.mrb[16].mxu0 %vm281_vm9, %v1971_v47 }
0x270c   :  { %2866 = vmatpush3.bf16.msra.mxu0 %v2863_v33 }
0x270d   :  { %2868 = vmatprep.subr.bf16.mxu0 %v2867_v35 }
0x2710   :  { %2870 = vmatpush3.bf16.msra.mxu0 %v2867_v35 }
0x27de   :  { %v2040_v49 = vpop.f32.mrb[16].mxu0 }
0x27df   :  { %v2044_v50 = vadd.f32 %v2040_v49, %v1964_v48  ;;  %v2732_v51 = vpop.f32.mrb[17].mxu0 }
0x27e1   :  { %3020 = vtanh.f32 %v2044_v50  ;;  %v2444_v53 = vmul.f32 -1.442695, %v2044_v50 }
0x27e3   :  { %3022 = vpow2.f32 %v2444_v53 }
0x27eb   :  { %v3021_v52 = vpop.eup %3020 }
0x27ec   :  { %2054 = vrot.lane.b32.xlu1 %v3021_v52, %s3235_s12 }
0x27ed   :  { %v3023_v55 = vpop.eup %3022 }
0x27ee   :  { %v2048_v56 = vadd.f32 1.0, %v3023_v55 }
0x27f0   :  { %3024 = vrcp.f32 %v2048_v56 }
0x27fa   :  { %v3025_v58 = vpop.eup %3024 }
0x27fb   :  { %v2052_v61 = vmul.f32 %v3025_v58, %v1951_v43 }
0x285e   :  { %v2055_v59 = vpop.permute.xlu1 %2054 }
0x285f   :  { %v2057_v60 = vmul.f32 %v3025_v58, %v2055_v59 }
0x2861   :  { %2059 = vrot.lane.b32.xlu0 %v2057_v60, %s3235_s12 }
0x28d3   :  { %v2060_v62 = vpop.permute.xlu0 %2059 }
0x28d4   :  { %v2062_v0 = vadd.f32 %v2060_v62, %v2052_v61 }
0x28d6   :  { %3026 = vtanh.f32 %v2062_v0 }
0x28e0   :  { %v3027_v3 = vpop.eup %3026 }
0x28e1   :  { %2065 = vrot.lane.b32.xlu1 %v3027_v3, %s3235_s12 }
0x2953   :  { %v2066_v4 = vpop.permute.xlu1 %2065 }
0x2954   :  { %v2068_v5 = vmul.f32 %v3025_v58, %v2066_v4 }
0x2956   :  { %2081 = vrot.lane.b32.xlu0 %v2068_v5, %s3236_s3 }
0x29c8   :  { %v2082_v6 = vpop.permute.xlu0 %2081 }
0x29c9   :  { %2742 = vmatmul.mubr.msk.f32.vlgmr.msra.gmra.mrb[16].mxu1 %vm281_vm9, %v2082_v6 }
0x2a9c   :  { %v2151_v19 = vpop.f32.mrb[16].mxu1 }
0x2a9d   :  { %v2155_v8 = vadd.f32 %v2151_v19, %v2075_v7  ;;  %v2743_v9 = vpop.f32.mrb[17].mxu1  ;;  %v2450_v7 = vld [vmem:[%s3740_s9] ss:$0 sm:$0xff]  ;;  %s3238_s9 = smov 5  }
0x2a9f   :  { %3028 = vtanh.f32 %v2155_v8  ;;  %v2446_v11 = vmul.f32 -1.442695, %v2155_v8 }
0x2aa1   :  { %3030 = vpow2.f32 %v2446_v11 }
0x2aa9   :  { %v3029_v10 = vpop.eup %3028 }
0x2aaa   :  { %2165 = vrot.lane.b32.xlu1 %v3029_v10, %s3235_s12 }
0x2aab   :  { %v3031_v12 = vpop.eup %3030 }
0x2aac   :  { %v2159_v13 = vadd.f32 1.0, %v3031_v12 }
0x2aae   :  { %3032 = vrcp.f32 %v2159_v13  ;;  %v2451_v13 = vld [vmem:[#allocation4] ss:$0 sm:$0xff] }
0x2aaf   :  { %3034 = vtanh.f32 %v3618_v32 }
0x2ab0   :  { %3036 = vtanh.f32 %v1957_v46 }
0x2ab1   :  { %3038 = vtanh.f32 %v3646_v57 }
0x2ab2   :  { %3040 = vtanh.f32 %v3659_v40 }
0x2ab8   :  { %v3033_v14 = vpop.eup %3032 }
0x2ab9   :  { %v3035_v63 = vpop.eup %3034  ;;  %v2163_v20 = vmul.f32 %v3033_v14, %v2062_v0  ;;  %v2447_v0 = vld [vmem:[%s3739_s8] ss:$0 sm:$0xff]  ;;  %s3237_s8 = smov 4  }
0x2aba   :  { %v3037_v17 = vpop.eup %3036 }
0x2abb   :  { %v3039_v18 = vpop.eup %3038 }
0x2abc   :  { %v3041_v32 = vpop.eup %3040 }
0x2b1c   :  { %v2166_v15 = vpop.permute.xlu1 %2165 }
0x2b1d   :  { %v2168_v38 = vmul.f32 %v3033_v14, %v2166_v15 }
0x2b1f   :  { %2170 = vrot.lane.b32.xlu0 %v2168_v38, %s3235_s12 }
0x2b23   :  { %1516 = vrot.lane.b32.xlu0 %v3035_v63, %s3236_s3 }
0x2b27   :  { %1960 = vrot.lane.b32.xlu0 %v3037_v17, %s3236_s3 }
0x2b2b   :  { %1738 = vrot.lane.b32.xlu0 %v3039_v18, %s3236_s3 }
0x2b2f   :  { %1849 = vrot.lane.b32.xlu0 %v3041_v32, %s3236_s3 }
0x2b91   :  { %v2171_v21 = vpop.permute.xlu0 %2170 }
0x2b92   :  { %v2173_v22 = vadd.f32 %v2171_v21, %v2163_v20 }
0x2b94   :  { %3042 = vtanh.f32 %v2173_v22 }
0x2b95   :  { %v1517_v36 = vpop.permute.xlu0 %1516  ;;  %3044 = vtanh.f32 %v3632_v54 }
0x2b96   :  { %1519 = vst.msk [vmem:[#allocation3 + $0x2] sm:$0x3] %vm385_vm10, %v1517_v36  ;;  %3046 = vtanh.f32 %v3604_v16 }
0x2b97   :  { %3048 = vtanh.f32 %v2068_v5 }
0x2b99   :  { %v1961_v57 = vpop.permute.xlu0 %1960 }
0x2b9a   :  { %1963 = vst.msk [vmem:[#allocation3 + $0xa] sm:$0x3] %vm385_vm10, %v1961_v57 }
0x2b9d   :  { %v1739_v23 = vpop.permute.xlu0 %1738  ;;  %v2187_v42 = vld [vmem:[#allocation3 + $0x2] sm:$0x3] }
0x2b9e   :  { %v3043_v24 = vpop.eup %3042  ;;  %1741 = vst.msk [vmem:[#allocation3 + $0x6] sm:$0x3] %vm385_vm10, %v1739_v23  ;;  %v2195_v43 = vrot.slane %v2187_v42, 6 }
0x2b9f   :  { %2176 = vrot.lane.b32.xlu1 %v3043_v24, %s3235_s12  ;;  %v3045_v26 = vpop.eup %3044 }
0x2ba0   :  { %v3047_v40 = vpop.eup %3046 }
0x2ba1   :  { %v1850_v25 = vpop.permute.xlu0 %1849  ;;  %v3049_v54 = vpop.eup %3048  ;;  %v2191_v52 = vld [vmem:[#allocation3 + $0xa] sm:$0x3] }
0x2ba2   :  { %1852 = vst.msk [vmem:[#allocation3 + $0x8] sm:$0x3] %vm385_vm10, %v1850_v25  ;;  %v2204_v56 = vrot.slane %v2191_v52, 6 }
0x2ba3   :  { %1627 = vrot.lane.b32.xlu1 %v3045_v26, %s3236_s3 }
0x2ba5   :  { %v2189_v37 = vld [vmem:[#allocation3 + $0x6] sm:$0x3] }
0x2ba6   :  { %v2201_v46 = vrot.slane %v2189_v37, 2 }
0x2ba7   :  { %1405 = vrot.lane.b32.xlu1 %v3047_v40, %s3236_s3 }
0x2ba9   :  { %v2190_v53 = vld [vmem:[#allocation3 + $0x8] sm:$0x3] }
0x2baa   :  { %v2215_v60 = vsel %vm161_vm5, %v2190_v53, %v2204_v56 }
0x2bab   :  { %2071 = vrot.lane.b32.xlu1 %v3049_v54, %s3236_s3 }
0x2c11   :  { %v2177_v16 = vpop.permute.xlu1 %2176 }
0x2c12   :  { %v2179_v27 = vmul.f32 %v3033_v14, %v2177_v16 }
0x2c14   :  { %3050 = vtanh.f32 %v2179_v27 }
0x2c15   :  { %v1628_v39 = vpop.permute.xlu1 %1627 }
0x2c16   :  { %1630 = vst.msk [vmem:[#allocation3 + $0x4] sm:$0x3] %vm385_vm10, %v1628_v39 }
0x2c19   :  { %v1406_v41 = vpop.permute.xlu1 %1405 }
0x2c1a   :  { %1408 = vst.msk [vmem:[#allocation3] sm:$0x3] %vm385_vm10, %v1406_v41 }
0x2c1d   :  { %v2072_v31 = vpop.permute.xlu1 %2071  ;;  %v2188_v1 = vld [vmem:[#allocation3 + $0x4] sm:$0x3] }
0x2c1e   :  { %v3051_v2 = vpop.eup %3050  ;;  %2074 = vst.msk [vmem:[#allocation3 + $0xc] sm:$0x3] %vm385_vm10, %v2072_v31  ;;  %v2198_v45 = vrot.slane %v2188_v1, 4 }
0x2c1f   :  { %2182 = vrot.lane.b32.xlu1 %v3051_v2, %s3236_s3 }
0x2c21   :  { %v2186_v44 = vld [vmem:[#allocation3] sm:$0x3] }
0x2c22   :  { %v2212_v47 = vsel %vm161_vm5, %v2186_v44, %v2195_v43 }
0x2c23   :  { %v2213_v48 = vsel %vm163_vm6, %v2212_v47, %v2198_v45 }
0x2c24   :  { %v2214_v49 = vsel %vm165_vm7, %v2213_v48, %v2201_v46 }
0x2c25   :  { %2752 = vmatprep.mubr.msk.f32.mxu0 %vm281_vm9, %v2214_v49  ;;  %v2192_v51 = vld [vmem:[#allocation3 + $0xc] sm:$0x3] }
0x2c26   :  { %v2207_v55 = vrot.slane %v2192_v51, 4 }
0x2c28   :  { %v2216_v61 = vsel %vm163_vm6, %v2215_v60, %v2207_v55 }
0x2c91   :  { %v2183_v50 = vpop.permute.xlu1 %2182 }
0x2c92   :  { %2185 = vst.msk [vmem:[#allocation3 + $0xe] sm:$0x3] %vm385_vm10, %v2183_v50 }
0x2c99   :  { %v2193_v58 = vld [vmem:[#allocation3 + $0xe] sm:$0x3] }
0x2c9a   :  { %v2210_v59 = vrot.slane %v2193_v58, 2 }
0x2c9c   :  { %v2217_v62 = vsel %vm165_vm7, %v2216_v61, %v2210_v59 }
0x2c9d   :  { %2753 = vmatmul.mubr.msk.f32.vlgmr.msra.gmra.mrb[18].mxu0 %vm281_vm9, %v2217_v62 }
0x2d70   :  { %v2754_v3 = vpop.f32.mrb[18].mxu0 }
0x2d71   :  { %v2307_v4 = vadd.f32 %v2754_v3, %v2447_v0  ;;  %v2301_v5 = vpop.f32.mrb[19].mxu0 }
0x2d72   :  { %v2302_v6 = vadd.f32 %v2447_v0, %v2301_v5 }
0x2d73   :  { %v2311_v19 = vmax.f32 %v2307_v4, 0.0 }
0x2d74   :  { %v2310_v8 = vmax.f32 %v2302_v6, 0.0 }
0x2d75   :  { %v2320_v9 = vmul.f32 %v2450_v7, %v2311_v19 }
0x2d76   :  { %v2319_v10 = vmul.f32 %v2450_v7, %v2310_v8 }
0x2d77   :  { %v2324_v11 = vsel %vm281_vm9, %v2320_v9, 0.0 }
0x2d78   :  { %2325 = vadd.xlane.f32.xlu1 %v2324_v11  ;;  %v2321_v12 = vsel %vm281_vm9, %v2319_v10, 0.0 }
0x2d79   :  { %2322 = vadd.xlane.f32.xlu0 %v2321_v12 }
0x2e05   :  { %v2326_v14 = vpop.xlane.xlu1 %2325 }
0x2e06   :  { %v2335_v15 = vadd.f32 %v2451_v13, %v2326_v14  ;;  %v2323_v38 = vpop.xlane.xlu0 %2322 }
0x2e07   :  { %v2334_v63 = vadd.f32 %v2451_v13, %v2323_v38 }
0x2e08   :  { %v2453_v17 = vmul.f32 -1.442695, %v2335_v15 }
0x2e09   :  { %v2452_v18 = vmul.f32 -1.442695, %v2334_v63 }
0x2e0a   :  { %3052 = vpow2.f32 %v2453_v17 }
0x2e0b   :  { %3054 = vpow2.f32 %v2452_v18 }
0x2e14   :  { %v3053_v32 = vpop.eup %3052 }
0x2e15   :  { %v3055_v20 = vpop.eup %3054  ;;  %v2343_v21 = vadd.f32 1.0, %v3053_v32 }
0x2e16   :  { %v2342_v22 = vadd.f32 1.0, %v3055_v20 }
0x2e17   :  { %3056 = vrcp.f32 %v2343_v21 }
0x2e18   :  { %3058 = vrcp.f32 %v2342_v22 }
0x2e21   :  { %v3057_v36 = vpop.eup %3056 }
0x2e22   :  { %v3059_v57 = vpop.eup %3058  ;;  %2362 = vrot.lane.b32.xlu1 %v3057_v36, %s3237_s8  ;;  %v2365_v23 = vrot.slane %v3057_v36, 2  ;;  %v2369_v26 = vrot.slane %v3057_v36, 4  ;;  %v2373_v54 = vrot.slane %v3057_v36, 6 }
0x2e23   :  { %v2353_v24 = vrot.slane %v3059_v57, 4  ;;  %v2349_v25 = vrot.slane %v3059_v57, 2  ;;  %v2357_v40 = vrot.slane %v3059_v57, 6 }
0x2e24   :  { %2366 = vrot.lane.b32.xlu0 %v2365_v23, %s3238_s9 }
0x2e26   :  { %2354 = vrot.lane.b32.xlu1 %v2353_v24, %s3239_s17 }
0x2e28   :  { %2350 = vrot.lane.b32.xlu0 %v2349_v25, %s3240_s4 }
0x2e2a   :  { %2370 = vrot.lane.b32.xlu1 %v2369_v26, %s3241_s22 }
0x2e2c   :  { %2358 = vrot.lane.b32.xlu0 %v2357_v40, %s3242_s18 }
0x2e30   :  { %2374 = vrot.lane.b32.xlu0 %v2373_v54, %s3243_s19 }
0x2e94   :  { %v2363_v16 = vpop.permute.xlu1 %2362 }
0x2e96   :  { %v2367_v27 = vpop.permute.xlu0 %2366 }
0x2e98   :  { %v2355_v29 = vpop.permute.xlu1 %2354 }
0x2e9a   :  { %v2351_v28 = vpop.permute.xlu0 %2350 }
0x2e9b   :  { %v2378_v30 = vsel %vm2377_vm11, %v3059_v57, %v2351_v28 }
0x2e9c   :  { %v2380_v33 = vsel %vm2379_vm12, %v2378_v30, %v2355_v29  ;;  %v2371_v41 = vpop.permute.xlu1 %2370 }
0x2e9e   :  { %v2359_v34 = vpop.permute.xlu0 %2358 }
0x2e9f   :  { %v2382_v35 = vsel %vm2381_vm13, %v2380_v33, %v2359_v34 }
0x2ea0   :  { %v2384_v39 = vsel %vm2383_vm14, %v2382_v35, %v2363_v16 }
0x2ea1   :  { %v2386_v31 = vsel %vm2385_vm15, %v2384_v39, %v2367_v27 }
0x2ea2   :  { %v2388_v42 = vsel %vm2387_vm0, %v2386_v31, %v2371_v41  ;;  %v2375_v2 = vpop.permute.xlu0 %2374 }
0x2ea3   :  { %v2390_v1 = vsel %vm2389_vm1, %v2388_v42, %v2375_v2 }
0x2ea4   :  { %2392 = vst.msk [vmem:[#allocation16] sm:$0x3] %vm2391_vm2, %v2390_v1 }
0x2ea5   :  { %3203 = shalt.err (!%p3200_p10)
}
0x2ea6   :  { %s3204_s1 = scalar_lea.hbm %s3742_s11, 32 }
0x2ea7   :  { %p3205_p11 = scmp.ne.s32.totalorder %s3742_s11, %s3204_s1  ;;  %p3208_p12 = scmp.lt.u32.totalorder %s3204_s1, %s3742_s11 }
0x2ea9   :  { %p3210_p13 = pnand %p3208_p12, %p3205_p11 }
0x2eab   :  { %3213 = shalt.err (!%p3210_p13)
}
0x2eac   :  { %2402 = dma.vmem_to_hbm [thread:$0]  %s2400_s10, 32, %s3742_s11, [#allocation7]  }
0x2ead   :  { %3222 = dma.done.wait [#allocation7], 32  }
0x2eae   :  { %3223 = vsyncadd [#allocation7], 4294967264 }
0x2eaf   :  { %2406 = vsyncpa [#allocation6], 1 }
0x2eb0   :  { %2407 = vsyncpa [#allocation9], 1 }
0x2eb1   :  { %2408 = vsyncpa [#allocation12], 1 }
0x2eb2   :  { %2409 = vsyncpa [#allocation15], 1 }
0x2eb3   :  { %2410 = vsyncpa [#allocation7], 1 }

</bundles_post_ra>
